<compile_context>
chip_gen: v5e
topology: v5e:2x2
jax: 0.10.0
libtpu: 0.0.40
codegen_flags: <defaults>
</compile_context>

<pallas_src>
import functools

import jax
import jax.numpy as jnp
from jax import lax
from jax.experimental import pallas as pl
from jax.experimental.pallas import tpu as pltpu

EPS = 1e-5  # LayerNorm1d eps

# Whole-array-resident-in-VMEM spec (all kernels are single-invocation, grid-free).
_VMEM = pl.BlockSpec(memory_space=pltpu.MemorySpace.VMEM)


def _layernorm(v, dim):
    """LayerNorm1d: gamma=1, beta=0, unbiased variance (torch.var default).

    Fused single pass: sum and sum-of-squares reductions can issue together instead
    of mean followed by a dependent second reduction.
    """
    s1 = jnp.sum(v, axis=-1, keepdims=True)
    s2 = jnp.sum(v * v, axis=-1, keepdims=True)
    mean = s1 * (1.0 / dim)
    var = (s2 - s1 * mean) * (1.0 / (dim - 1))
    return (v - mean) * lax.rsqrt(var + EPS)


def embed_kernel(ids_ref, tok_ref, pos_ref, o_ref):
    """token_embeddings(x) + position_embeddings(arange(T)) via one-hot MXU matmul."""
    ids = ids_ref[...]                                            # (B*T, 1) int32
    n, vocab = ids.shape[0], tok_ref.shape[0]
    onehot = (ids == lax.broadcasted_iota(jnp.int32, (n, vocab), 1)).astype(jnp.float32)
    o_ref[...] = (jnp.dot(onehot, tok_ref[...], preferred_element_type=jnp.float32)
                  + pos_ref[...]).astype(o_ref.dtype)


def transformer_block_kernel(x_ref, wqkv_ref, w1_ref, b1_ref, w2_ref, b2_ref, o_ref,
                             *, batch, seq_len, num_heads):
    B, T, H = batch, seq_len, num_heads
    x = x_ref[...].astype(jnp.float32)                            # (B*T, C)
    C = x.shape[-1]
    Hd = C // H

    # ---- sub-block 1: masked multi-head self-attention on LN(x) ----
    xn = _layernorm(x, C)
    qkv = jnp.dot(xn, wqkv_ref[...], preferred_element_type=jnp.float32)   # (B*T, 3C)

    # Gather the per-(batch, head) (T, Hd) tiles onto a leading batch axis so both
    # attention contractions are single batched dot_generals: no per-head K.T
    # transposes, no H*B tiny dots, no per-head score materialization.
    def head_tiles(col0):
        return jnp.stack(
            [qkv[b * T:(b + 1) * T, col0 + h * Hd: col0 + (h + 1) * Hd]
             for b in range(B) for h in range(H)],
            axis=0)                                               # (B*H, T, Hd)

    q, k, v = head_tiles(0), head_tiles(C), head_tiles(2 * C)

    # NOTE: reference scales by the full embedding dim C, not head_dim (intentional).
    scale = 1.0 / (C ** 0.5)
    row = lax.broadcasted_iota(jnp.int32, (T, T), 0)
    col = lax.broadcasted_iota(jnp.int32, (T, T), 1)
    causal = (col <= row)[None, :, :]                             # (1, T, T)

    s = jnp.einsum('bqd,bkd->bqk', q, k, preferred_element_type=jnp.float32) * scale
    s = jnp.where(causal, s, -1e30)   # finite fill: same softmax result as -inf, NaN-safe
    p = jax.nn.softmax(s, axis=-1)
    ctx = jnp.einsum('bqk,bkd->bqd', p, v, preferred_element_type=jnp.float32)  # (B*H,T,Hd)

    attn = jnp.concatenate(
        [jnp.concatenate([ctx[b * H + h] for h in range(H)], axis=-1)   # heads -> lanes
         for b in range(B)],
        axis=0)                                                        # batches -> rows

    x1 = x + attn

    # ---- sub-block 2: feed-forward on LN(x1) ----
    xn2 = _layernorm(x1, C)
    h1 = jnp.maximum(
        jnp.dot(xn2, w1_ref[...], preferred_element_type=jnp.float32) + b1_ref[...],
        0.0)                                                           # (B*T, 4C)
    h2 = jnp.dot(h1, w2_ref[...], preferred_element_type=jnp.float32) + b2_ref[...]
    # TODO(synk): Dropout(p=0.2) treated as identity (inference mode); a training-time
    # mask would need pltpu.prng_seed / pltpu.prng_random_bits.
    o_ref[...] = (x1 + h2).astype(o_ref.dtype)


def lm_head_kernel(x_ref, wp_ref, bp_ref, o_ref):
    """Final LayerNorm1d + linear projection to vocab logits (lane-dense output)."""
    x = x_ref[...].astype(jnp.float32)
    xn = _layernorm(x, x.shape[-1])
    o_ref[...] = (jnp.dot(xn, wp_ref[...], preferred_element_type=jnp.float32)
                  + bp_ref[...]).astype(o_ref.dtype)


def _call(kernel, out_shape, *args):
    return pl.pallas_call(
        kernel,
        out_shape=out_shape,
        in_specs=[_VMEM] * len(args),
        out_specs=_VMEM,
    )(*args)


@functools.partial(jax.jit, static_argnames=("num_heads",))
def gpt_forward(ids, params, num_heads):
    tok_emb, pos_emb, blocks, wp, bp = params
    B, T = ids.shape
    vocab, C = tok_emb.shape
    BT = B * T

    # Flatten once in the wrapper to a (B*T, C) slab; all kernels are single-invocation.
    ids2d = ids.reshape(BT, 1).astype(jnp.int32)
    pos_all = jnp.broadcast_to(pos_emb[None, :T, :], (B, T, C)).reshape(BT, C)

    h = _call(embed_kernel, jax.ShapeDtypeStruct((BT, C), jnp.float32),
              ids2d, tok_emb, pos_all)

    for (wqkv, w1, b1, w2, b2) in blocks:
        kernel = functools.partial(transformer_block_kernel,
                                   batch=B, seq_len=T, num_heads=num_heads)
        h = _call(kernel, jax.ShapeDtypeStruct((BT, C), jnp.float32),
                  h, wqkv, w1, b1, w2, b2)

    logits = _call(lm_head_kernel, jax.ShapeDtypeStruct((BT, vocab), jnp.float32),
                   h, wp, bp)
    return logits.reshape(B, T, vocab)


def reference_gpt(ids, params, num_heads):
    """Pure-JAX forward mirroring the PyTorch GPT exactly (two-pass LN, -inf mask)."""
    tok_emb, pos_emb, blocks, wp, bp = params
    B, T = ids.shape
    C = tok_emb.shape[1]
    Hd = C // num_heads

    def ln(v):
        m = v.mean(-1, keepdims=True)
        var = ((v - m) ** 2).sum(-1, keepdims=True) / (v.shape[-1] - 1)
        return (v - m) / jnp.sqrt(var + EPS)

    x = tok_emb[ids] + pos_emb[None, :T, :]
    causal = jnp.tril(jnp.ones((T, T), bool))
    for (wqkv, w1, b1, w2, b2) in blocks:
        xn = ln(x)
        qkv = xn @ wqkv
        Q, K, Vv = qkv[..., :C], qkv[..., C:2 * C], qkv[..., 2 * C:]
        heads = []
        for hh in range(num_heads):
            sl = slice(hh * Hd, (hh + 1) * Hd)
            s = Q[..., sl] @ jnp.swapaxes(K[..., sl], 1, 2) / (C ** 0.5)
            s = jnp.where(causal, s, -jnp.inf)
            heads.append(jax.nn.softmax(s, axis=-1) @ Vv[..., sl])
        x = x + jnp.concatenate(heads, axis=-1)
        x = x + (jax.nn.relu(ln(x) @ w1 + b1) @ w2 + b2)
    return ln(x) @ wp + bp


if __name__ == "__main__":
    B, T, C, H = 2, 8, 32, 4            # batch, context_size, embedding_dim, num_heads
    VOCAB, NBLOCKS = 128, 2             # vocab_size, num_blocks

    key = jax.random.PRNGKey(0)
    k_ids, k_tok, k_pos, k_head_w, k_head_b, k_blk = jax.random.split(key, 6)

    ids = jax.random.randint(k_ids, (B, T), 0, VOCAB, dtype=jnp.int32)

    tok_emb = 0.1 * jax.random.normal(k_tok, (VOCAB, C), jnp.float32)
    pos_emb = 0.1 * jax.random.normal(k_pos, (T, C), jnp.float32)

    blocks = []
    for bk in jax.random.split(k_blk, NBLOCKS):
        kq, k1, kb1, k2, kb2 = jax.random.split(bk, 5)
        # Per-head Q/K/V weights stacked column-wise, then Q|K|V fused into one (C, 3C)
        # matrix: columns [0:C] = Q heads, [C:2C] = K heads, [2C:3C] = V heads.
        wqkv = 0.1 * jax.random.normal(kq, (C, 3 * C), jnp.float32)
        w1 = 0.1 * jax.random.normal(k1, (C, 4 * C), jnp.float32)
        b1 = 0.1 * jax.random.normal(kb1, (1, 4 * C), jnp.float32)
        w2 = 0.1 * jax.random.normal(k2, (4 * C, C), jnp.float32)
        b2 = 0.1 * jax.random.normal(kb2, (1, C), jnp.float32)
        blocks.append((wqkv, w1, b1, w2, b2))

    wp = 0.1 * jax.random.normal(k_head_w, (C, VOCAB), jnp.float32)
    bp = 0.1 * jax.random.normal(k_head_b, (1, VOCAB), jnp.float32)

    params = (tok_emb, pos_emb, tuple(blocks), wp, bp)

    out = gpt_forward(ids, params, num_heads=H)
    out = jax.block_until_ready(out)

    ref = reference_gpt(ids, params, num_heads=H)
    assert out.shape == (B, T, VOCAB)
    assert jnp.allclose(out, ref, atol=5e-4, rtol=5e-4), (
        f"max abs err {jnp.max(jnp.abs(out - ref))}")

    print("KERNEL_OK")
</pallas_src>

<mosaic_0001>
module attributes {stable_mosaic.version = 11 : i64} {
  func.func @embed_kernel(%arg0: memref<16x1xi32, #tpu.memory_space<vmem>>, %arg1: memref<128x32xf32, #tpu.memory_space<vmem>>, %arg2: memref<16x32xf32, #tpu.memory_space<vmem>>, %arg3: memref<16x32xf32, #tpu.memory_space<vmem>>) attributes {dimension_semantics = [], scalar_prefetch = 0 : i64, scratch_operands = 0 : i64, tpu.core_type = #tpu.core_type<tc>} {
    %c0 = arith.constant 0 : index
    %c0_0 = arith.constant 0 : index
    %0 = vector.load %arg0[%c0, %c0_0] : memref<16x1xi32, #tpu.memory_space<vmem>>, vector<16x1xi32>
    %1 = tpu.iota {dimensions = array<i32: 1>} : vector<16x128xi32>
    %2 = vector.broadcast %0 : vector<16x1xi32> to vector<16x128xi32>
    %3 = arith.cmpi eq, %2, %1 : vector<16x128xi32>
    %4 = arith.extui %3 : vector<16x128xi1> to vector<16x128xi32>
    %5 = arith.sitofp %4 : vector<16x128xi32> to vector<16x128xf32>
    %c0_1 = arith.constant 0 : index
    %c0_2 = arith.constant 0 : index
    %6 = vector.load %arg1[%c0_1, %c0_2] : memref<128x32xf32, #tpu.memory_space<vmem>>, vector<128x32xf32>
    %cst = arith.constant dense<0.000000e+00> : vector<16x32xf32>
    %7 = tpu.matmul %5, %6, %cst {dimension_numbers = #tpu.dot_dimension_numbers<[1], [0], [0], [1], [0, 0, 1, 1], [], []>} : vector<16x128xf32>, vector<128x32xf32>, vector<16x32xf32> -> vector<16x32xf32>
    %c0_3 = arith.constant 0 : index
    %c0_4 = arith.constant 0 : index
    %8 = vector.load %arg2[%c0_3, %c0_4] : memref<16x32xf32, #tpu.memory_space<vmem>>, vector<16x32xf32>
    %9 = arith.addf %7, %8 : vector<16x32xf32>
    %c0_5 = arith.constant 0 : index
    %c0_6 = arith.constant 0 : index
    %10 = vector.load %arg3[%c0_5, %c0_6] : memref<16x32xf32, #tpu.memory_space<vmem>>, vector<16x32xf32>
    tpu.vector_store %arg3[%c0_5, %c0_6], %9 {strides = array<i32>} : memref<16x32xf32, #tpu.memory_space<vmem>>, vector<16x32xf32>,
    return
  }
}

module attributes {stable_mosaic.version = 11 : i64} {
  func.func @lm_head_kernel(%arg0: memref<16x32xf32, #tpu.memory_space<vmem>>, %arg1: memref<32x128xf32, #tpu.memory_space<vmem>>, %arg2: memref<1x128xf32, #tpu.memory_space<vmem>>, %arg3: memref<16x128xf32, #tpu.memory_space<vmem>>) attributes {dimension_semantics = [], scalar_prefetch = 0 : i64, scratch_operands = 0 : i64, tpu.core_type = #tpu.core_type<tc>} {
    %c0 = arith.constant 0 : index
    %c0_0 = arith.constant 0 : index
    %0 = vector.load %arg0[%c0, %c0_0] : memref<16x32xf32, #tpu.memory_space<vmem>>, vector<16x32xf32>
    %cst = arith.constant dense<0.000000e+00> : vector<16xf32>
    %1 = vector.multi_reduction <add>, %0, %cst [1] : vector<16x32xf32> to vector<16xf32>
    %2 = vector.shape_cast %1 : vector<16xf32> to vector<16x1xf32>
    %3 = arith.mulf %0, %0 : vector<16x32xf32>
    %cst_1 = arith.constant dense<0.000000e+00> : vector<16xf32>
    %4 = vector.multi_reduction <add>, %3, %cst_1 [1] : vector<16x32xf32> to vector<16xf32>
    %5 = vector.shape_cast %4 : vector<16xf32> to vector<16x1xf32>
    %cst_2 = arith.constant 3.125000e-02 : f32
    %6 = vector.broadcast %cst_2 : f32 to vector<16x1xf32>
    %7 = arith.mulf %2, %6 : vector<16x1xf32>
    %8 = arith.mulf %2, %7 : vector<16x1xf32>
    %9 = arith.subf %5, %8 : vector<16x1xf32>
    %cst_3 = arith.constant 0.0322580636 : f32
    %10 = vector.broadcast %cst_3 : f32 to vector<16x1xf32>
    %11 = arith.mulf %9, %10 : vector<16x1xf32>
    %12 = vector.broadcast %7 : vector<16x1xf32> to vector<16x32xf32>
    %13 = arith.subf %0, %12 : vector<16x32xf32>
    %cst_4 = arith.constant 9.99999974E-6 : f32
    %14 = vector.broadcast %cst_4 : f32 to vector<16x1xf32>
    %15 = arith.addf %11, %14 : vector<16x1xf32>
    %16 = math.rsqrt %15 : vector<16x1xf32>
    %17 = vector.broadcast %16 : vector<16x1xf32> to vector<16x32xf32>
    %18 = arith.mulf %13, %17 : vector<16x32xf32>
    %c0_5 = arith.constant 0 : index
    %c0_6 = arith.constant 0 : index
    %19 = vector.load %arg1[%c0_5, %c0_6] : memref<32x128xf32, #tpu.memory_space<vmem>>, vector<32x128xf32>
    %cst_7 = arith.constant dense<0.000000e+00> : vector<16x128xf32>
    %20 = tpu.matmul %18, %19, %cst_7 {dimension_numbers = #tpu.dot_dimension_numbers<[1], [0], [0], [1], [0, 0, 1, 1], [], []>} : vector<16x32xf32>, vector<32x128xf32>, vector<16x128xf32> -> vector<16x128xf32>
    %c0_8 = arith.constant 0 : index
    %c0_9 = arith.constant 0 : index
    %21 = vector.load %arg2[%c0_8, %c0_9] : memref<1x128xf32, #tpu.memory_space<vmem>>, vector<1x128xf32>
    %22 = vector.broadcast %21 : vector<1x128xf32> to vector<16x128xf32>
    %23 = arith.addf %20, %22 : vector<16x128xf32>
    %c0_10 = arith.constant 0 : index
    %c0_11 = arith.constant 0 : index
    %24 = vector.load %arg3[%c0_10, %c0_11] : memref<16x128xf32, #tpu.memory_space<vmem>>, vector<16x128xf32>
    tpu.vector_store %arg3[%c0_10, %c0_11], %23 {strides = array<i32>} : memref<16x128xf32, #tpu.memory_space<vmem>>, vector<16x128xf32>,
    return
  }
}

module attributes {stable_mosaic.version = 11 : i64} {
  func.func @transformer_block_kernel(%arg0: memref<16x32xf32, #tpu.memory_space<vmem>>, %arg1: memref<32x96xf32, #tpu.memory_space<vmem>>, %arg2: memref<32x128xf32, #tpu.memory_space<vmem>>, %arg3: memref<1x128xf32, #tpu.memory_space<vmem>>, %arg4: memref<128x32xf32, #tpu.memory_space<vmem>>, %arg5: memref<1x32xf32, #tpu.memory_space<vmem>>, %arg6: memref<16x32xf32, #tpu.memory_space<vmem>>) attributes {dimension_semantics = [], scalar_prefetch = 0 : i64, scratch_operands = 0 : i64, tpu.core_type = #tpu.core_type<tc>} {
    %c0 = arith.constant 0 : index
    %c0_0 = arith.constant 0 : index
    %0 = vector.load %arg0[%c0, %c0_0] : memref<16x32xf32, #tpu.memory_space<vmem>>, vector<16x32xf32>
    %cst = arith.constant dense<0.000000e+00> : vector<16xf32>
    %1 = vector.multi_reduction <add>, %0, %cst [1] : vector<16x32xf32> to vector<16xf32>
    %2 = vector.shape_cast %1 : vector<16xf32> to vector<16x1xf32>
    %3 = arith.mulf %0, %0 : vector<16x32xf32>
    %cst_1 = arith.constant dense<0.000000e+00> : vector<16xf32>
    %4 = vector.multi_reduction <add>, %3, %cst_1 [1] : vector<16x32xf32> to vector<16xf32>
    %5 = vector.shape_cast %4 : vector<16xf32> to vector<16x1xf32>
    %cst_2 = arith.constant 3.125000e-02 : f32
    %6 = vector.broadcast %cst_2 : f32 to vector<16x1xf32>
    %7 = arith.mulf %2, %6 : vector<16x1xf32>
    %8 = arith.mulf %2, %7 : vector<16x1xf32>
    %9 = arith.subf %5, %8 : vector<16x1xf32>
    %cst_3 = arith.constant 0.0322580636 : f32
    %10 = vector.broadcast %cst_3 : f32 to vector<16x1xf32>
    %11 = arith.mulf %9, %10 : vector<16x1xf32>
    %12 = vector.broadcast %7 : vector<16x1xf32> to vector<16x32xf32>
    %13 = arith.subf %0, %12 : vector<16x32xf32>
    %cst_4 = arith.constant 9.99999974E-6 : f32
    %14 = vector.broadcast %cst_4 : f32 to vector<16x1xf32>
    %15 = arith.addf %11, %14 : vector<16x1xf32>
    %16 = math.rsqrt %15 : vector<16x1xf32>
    %17 = vector.broadcast %16 : vector<16x1xf32> to vector<16x32xf32>
    %18 = arith.mulf %13, %17 : vector<16x32xf32>
    %c0_5 = arith.constant 0 : index
    %c0_6 = arith.constant 0 : index
    %19 = vector.load %arg1[%c0_5, %c0_6] : memref<32x96xf32, #tpu.memory_space<vmem>>, vector<32x96xf32>
    %cst_7 = arith.constant dense<0.000000e+00> : vector<16x96xf32>
    %20 = tpu.matmul %18, %19, %cst_7 {dimension_numbers = #tpu.dot_dimension_numbers<[1], [0], [0], [1], [0, 0, 1, 1], [], []>} : vector<16x32xf32>, vector<32x96xf32>, vector<16x96xf32> -> vector<16x96xf32>
    %21 = vector.extract_strided_slice %20 {offsets = [0, 0], sizes = [8, 8], strides = [1, 1]} : vector<16x96xf32> to vector<8x8xf32>
    %22 = vector.extract_strided_slice %20 {offsets = [0, 8], sizes = [8, 8], strides = [1, 1]} : vector<16x96xf32> to vector<8x8xf32>
    %23 = vector.extract_strided_slice %20 {offsets = [0, 16], sizes = [8, 8], strides = [1, 1]} : vector<16x96xf32> to vector<8x8xf32>
    %24 = vector.extract_strided_slice %20 {offsets = [0, 24], sizes = [8, 8], strides = [1, 1]} : vector<16x96xf32> to vector<8x8xf32>
    %25 = vector.extract_strided_slice %20 {offsets = [8, 0], sizes = [8, 8], strides = [1, 1]} : vector<16x96xf32> to vector<8x8xf32>
    %26 = vector.extract_strided_slice %20 {offsets = [8, 8], sizes = [8, 8], strides = [1, 1]} : vector<16x96xf32> to vector<8x8xf32>
    %27 = vector.extract_strided_slice %20 {offsets = [8, 16], sizes = [8, 8], strides = [1, 1]} : vector<16x96xf32> to vector<8x8xf32>
    %28 = vector.extract_strided_slice %20 {offsets = [8, 24], sizes = [8, 8], strides = [1, 1]} : vector<16x96xf32> to vector<8x8xf32>
    %29 = vector.shape_cast %21 : vector<8x8xf32> to vector<1x8x8xf32>
    %30 = vector.shape_cast %22 : vector<8x8xf32> to vector<1x8x8xf32>
    %31 = vector.shape_cast %23 : vector<8x8xf32> to vector<1x8x8xf32>
    %32 = vector.shape_cast %24 : vector<8x8xf32> to vector<1x8x8xf32>
    %33 = vector.shape_cast %25 : vector<8x8xf32> to vector<1x8x8xf32>
    %34 = vector.shape_cast %26 : vector<8x8xf32> to vector<1x8x8xf32>
    %35 = vector.shape_cast %27 : vector<8x8xf32> to vector<1x8x8xf32>
    %36 = vector.shape_cast %28 : vector<8x8xf32> to vector<1x8x8xf32>
    %37 = tpu.concatenate %29, %30, %31, %32, %33, %34, %35, %36 in 0 : vector<1x8x8xf32>, vector<1x8x8xf32>, vector<1x8x8xf32>, vector<1x8x8xf32>, vector<1x8x8xf32>, vector<1x8x8xf32>, vector<1x8x8xf32>, vector<1x8x8xf32> -> vector<8x8x8xf32>
    %38 = vector.extract_strided_slice %20 {offsets = [0, 32], sizes = [8, 8], strides = [1, 1]} : vector<16x96xf32> to vector<8x8xf32>
    %39 = vector.extract_strided_slice %20 {offsets = [0, 40], sizes = [8, 8], strides = [1, 1]} : vector<16x96xf32> to vector<8x8xf32>
    %40 = vector.extract_strided_slice %20 {offsets = [0, 48], sizes = [8, 8], strides = [1, 1]} : vector<16x96xf32> to vector<8x8xf32>
    %41 = vector.extract_strided_slice %20 {offsets = [0, 56], sizes = [8, 8], strides = [1, 1]} : vector<16x96xf32> to vector<8x8xf32>
    %42 = vector.extract_strided_slice %20 {offsets = [8, 32], sizes = [8, 8], strides = [1, 1]} : vector<16x96xf32> to vector<8x8xf32>
    %43 = vector.extract_strided_slice %20 {offsets = [8, 40], sizes = [8, 8], strides = [1, 1]} : vector<16x96xf32> to vector<8x8xf32>
    %44 = vector.extract_strided_slice %20 {offsets = [8, 48], sizes = [8, 8], strides = [1, 1]} : vector<16x96xf32> to vector<8x8xf32>
    %45 = vector.extract_strided_slice %20 {offsets = [8, 56], sizes = [8, 8], strides = [1, 1]} : vector<16x96xf32> to vector<8x8xf32>
    %46 = vector.shape_cast %38 : vector<8x8xf32> to vector<1x8x8xf32>
    %47 = vector.shape_cast %39 : vector<8x8xf32> to vector<1x8x8xf32>
    %48 = vector.shape_cast %40 : vector<8x8xf32> to vector<1x8x8xf32>
    %49 = vector.shape_cast %41 : vector<8x8xf32> to vector<1x8x8xf32>
    %50 = vector.shape_cast %42 : vector<8x8xf32> to vector<1x8x8xf32>
    %51 = vector.shape_cast %43 : vector<8x8xf32> to vector<1x8x8xf32>
    %52 = vector.shape_cast %44 : vector<8x8xf32> to vector<1x8x8xf32>
    %53 = vector.shape_cast %45 : vector<8x8xf32> to vector<1x8x8xf32>
    %54 = tpu.concatenate %46, %47, %48, %49, %50, %51, %52, %53 in 0 : vector<1x8x8xf32>, vector<1x8x8xf32>, vector<1x8x8xf32>, vector<1x8x8xf32>, vector<1x8x8xf32>, vector<1x8x8xf32>, vector<1x8x8xf32>, vector<1x8x8xf32> -> vector<8x8x8xf32>
    %55 = vector.extract_strided_slice %20 {offsets = [0, 64], sizes = [8, 8], strides = [1, 1]} : vector<16x96xf32> to vector<8x8xf32>
    %56 = vector.extract_strided_slice %20 {offsets = [0, 72], sizes = [8, 8], strides = [1, 1]} : vector<16x96xf32> to vector<8x8xf32>
    %57 = vector.extract_strided_slice %20 {offsets = [0, 80], sizes = [8, 8], strides = [1, 1]} : vector<16x96xf32> to vector<8x8xf32>
    %58 = vector.extract_strided_slice %20 {offsets = [0, 88], sizes = [8, 8], strides = [1, 1]} : vector<16x96xf32> to vector<8x8xf32>
    %59 = vector.extract_strided_slice %20 {offsets = [8, 64], sizes = [8, 8], strides = [1, 1]} : vector<16x96xf32> to vector<8x8xf32>
    %60 = vector.extract_strided_slice %20 {offsets = [8, 72], sizes = [8, 8], strides = [1, 1]} : vector<16x96xf32> to vector<8x8xf32>
    %61 = vector.extract_strided_slice %20 {offsets = [8, 80], sizes = [8, 8], strides = [1, 1]} : vector<16x96xf32> to vector<8x8xf32>
    %62 = vector.extract_strided_slice %20 {offsets = [8, 88], sizes = [8, 8], strides = [1, 1]} : vector<16x96xf32> to vector<8x8xf32>
    %63 = vector.shape_cast %55 : vector<8x8xf32> to vector<1x8x8xf32>
    %64 = vector.shape_cast %56 : vector<8x8xf32> to vector<1x8x8xf32>
    %65 = vector.shape_cast %57 : vector<8x8xf32> to vector<1x8x8xf32>
    %66 = vector.shape_cast %58 : vector<8x8xf32> to vector<1x8x8xf32>
    %67 = vector.shape_cast %59 : vector<8x8xf32> to vector<1x8x8xf32>
    %68 = vector.shape_cast %60 : vector<8x8xf32> to vector<1x8x8xf32>
    %69 = vector.shape_cast %61 : vector<8x8xf32> to vector<1x8x8xf32>
    %70 = vector.shape_cast %62 : vector<8x8xf32> to vector<1x8x8xf32>
    %71 = tpu.concatenate %63, %64, %65, %66, %67, %68, %69, %70 in 0 : vector<1x8x8xf32>, vector<1x8x8xf32>, vector<1x8x8xf32>, vector<1x8x8xf32>, vector<1x8x8xf32>, vector<1x8x8xf32>, vector<1x8x8xf32>, vector<1x8x8xf32> -> vector<8x8x8xf32>
    %72 = tpu.iota {dimensions = array<i32: 0>} : vector<8x8xi32>
    %73 = tpu.iota {dimensions = array<i32: 1>} : vector<8x8xi32>
    %74 = arith.cmpi sle, %73, %72 : vector<8x8xi32>
    %75 = vector.shape_cast %74 : vector<8x8xi1> to vector<1x8x8xi1>
    "tpu.trace_start"() <{level = 10 : i32, message = "bqd,bkd->bqk"}> : () -> ()
    %cst_8 = arith.constant dense<0.000000e+00> : vector<8x8x8xf32>
    %76 = tpu.matmul %37, %54, %cst_8 {dimension_numbers = #tpu.dot_dimension_numbers<[2], [2], [1], [1], [0, 0, 0, 1, 1, 1], [0], [0]>} : vector<8x8x8xf32>, vector<8x8x8xf32>, vector<8x8x8xf32> -> vector<8x8x8xf32>
    "tpu.trace_stop"() : () -> ()
    %cst_9 = arith.constant 0.176776692 : f32
    %77 = vector.broadcast %cst_9 : f32 to vector<8x8x8xf32>
    %78 = arith.mulf %76, %77 : vector<8x8x8xf32>
    %cst_10 = arith.constant -1.000000e+30 : f32
    %79 = vector.shape_cast %75 : vector<1x8x8xi1> to vector<1x8x8xi1>
    %80 = vector.broadcast %79 : vector<1x8x8xi1> to vector<8x8x8xi1>
    %81 = vector.broadcast %cst_10 : f32 to vector<8x8x8xf32>
    %82 = arith.select %80, %78, %81 : vector<8x8x8xi1>, vector<8x8x8xf32>
    %cst_11 = arith.constant dense<0xFF800000> : vector<8x8xf32>
    %83 = vector.multi_reduction <maximumf>, %82, %cst_11 [2] : vector<8x8x8xf32> to vector<8x8xf32>
    %cst_12 = arith.constant 0xFF800000 : f32
    %84 = vector.broadcast %cst_12 : f32 to vector<8x8xf32>
    %85 = arith.maximumf %84, %83 : vector<8x8xf32>
    %86 = vector.shape_cast %85 : vector<8x8xf32> to vector<8x8x1xf32>
    %87 = vector.broadcast %86 : vector<8x8x1xf32> to vector<8x8x8xf32>
    %88 = arith.subf %82, %87 : vector<8x8x8xf32>
    %89 = math.exp %88 : vector<8x8x8xf32>
    %cst_13 = arith.constant dense<0.000000e+00> : vector<8x8xf32>
    %90 = vector.multi_reduction <add>, %89, %cst_13 [2] : vector<8x8x8xf32> to vector<8x8xf32>
    %91 = vector.shape_cast %90 : vector<8x8xf32> to vector<8x8x1xf32>
    %92 = vector.broadcast %91 : vector<8x8x1xf32> to vector<8x8x8xf32>
    %93 = arith.divf %89, %92 : vector<8x8x8xf32>
    "tpu.trace_start"() <{level = 10 : i32, message = "bqk,bkd->bqd"}> : () -> ()
    %cst_14 = arith.constant dense<0.000000e+00> : vector<8x8x8xf32>
    %94 = tpu.matmul %93, %71, %cst_14 {dimension_numbers = #tpu.dot_dimension_numbers<[2], [1], [1], [2], [0, 0, 0, 1, 1, 2], [0], [0]>} : vector<8x8x8xf32>, vector<8x8x8xf32>, vector<8x8x8xf32> -> vector<8x8x8xf32>
    "tpu.trace_stop"() : () -> ()
    %95 = vector.extract_strided_slice %94 {offsets = [0, 0, 0], sizes = [1, 8, 8], strides = [1, 1, 1]} : vector<8x8x8xf32> to vector<1x8x8xf32>
    %96 = vector.shape_cast %95 : vector<1x8x8xf32> to vector<8x8xf32>
    %97 = vector.extract_strided_slice %94 {offsets = [1, 0, 0], sizes = [1, 8, 8], strides = [1, 1, 1]} : vector<8x8x8xf32> to vector<1x8x8xf32>
    %98 = vector.shape_cast %97 : vector<1x8x8xf32> to vector<8x8xf32>
    %99 = vector.extract_strided_slice %94 {offsets = [2, 0, 0], sizes = [1, 8, 8], strides = [1, 1, 1]} : vector<8x8x8xf32> to vector<1x8x8xf32>
    %100 = vector.shape_cast %99 : vector<1x8x8xf32> to vector<8x8xf32>
    %101 = vector.extract_strided_slice %94 {offsets = [3, 0, 0], sizes = [1, 8, 8], strides = [1, 1, 1]} : vector<8x8x8xf32> to vector<1x8x8xf32>
    %102 = vector.shape_cast %101 : vector<1x8x8xf32> to vector<8x8xf32>
    %103 = tpu.concatenate %96, %98, %100, %102 in 1 : vector<8x8xf32>, vector<8x8xf32>, vector<8x8xf32>, vector<8x8xf32> -> vector<8x32xf32>
    %104 = vector.extract_strided_slice %94 {offsets = [4, 0, 0], sizes = [1, 8, 8], strides = [1, 1, 1]} : vector<8x8x8xf32> to vector<1x8x8xf32>
    %105 = vector.shape_cast %104 : vector<1x8x8xf32> to vector<8x8xf32>
    %106 = vector.extract_strided_slice %94 {offsets = [5, 0, 0], sizes = [1, 8, 8], strides = [1, 1, 1]} : vector<8x8x8xf32> to vector<1x8x8xf32>
    %107 = vector.shape_cast %106 : vector<1x8x8xf32> to vector<8x8xf32>
    %108 = vector.extract_strided_slice %94 {offsets = [6, 0, 0], sizes = [1, 8, 8], strides = [1, 1, 1]} : vector<8x8x8xf32> to vector<1x8x8xf32>
    %109 = vector.shape_cast %108 : vector<1x8x8xf32> to vector<8x8xf32>
    %110 = vector.extract_strided_slice %94 {offsets = [7, 0, 0], sizes = [1, 8, 8], strides = [1, 1, 1]} : vector<8x8x8xf32> to vector<1x8x8xf32>
    %111 = vector.shape_cast %110 : vector<1x8x8xf32> to vector<8x8xf32>
    %112 = tpu.concatenate %105, %107, %109, %111 in 1 : vector<8x8xf32>, vector<8x8xf32>, vector<8x8xf32>, vector<8x8xf32> -> vector<8x32xf32>
    %113 = tpu.concatenate %103, %112 in 0 : vector<8x32xf32>, vector<8x32xf32> -> vector<16x32xf32>
    %114 = arith.addf %0, %113 : vector<16x32xf32>
    %cst_15 = arith.constant dense<0.000000e+00> : vector<16xf32>
    %115 = vector.multi_reduction <add>, %114, %cst_15 [1] : vector<16x32xf32> to vector<16xf32>
    %116 = vector.shape_cast %115 : vector<16xf32> to vector<16x1xf32>
    %117 = arith.mulf %114, %114 : vector<16x32xf32>
    %cst_16 = arith.constant dense<0.000000e+00> : vector<16xf32>
    %118 = vector.multi_reduction <add>, %117, %cst_16 [1] : vector<16x32xf32> to vector<16xf32>
    %119 = vector.shape_cast %118 : vector<16xf32> to vector<16x1xf32>
    %cst_17 = arith.constant 3.125000e-02 : f32
    %120 = vector.broadcast %cst_17 : f32 to vector<16x1xf32>
    %121 = arith.mulf %116, %120 : vector<16x1xf32>
    %122 = arith.mulf %116, %121 : vector<16x1xf32>
    %123 = arith.subf %119, %122 : vector<16x1xf32>
    %cst_18 = arith.constant 0.0322580636 : f32
    %124 = vector.broadcast %cst_18 : f32 to vector<16x1xf32>
    %125 = arith.mulf %123, %124 : vector<16x1xf32>
    %126 = vector.broadcast %121 : vector<16x1xf32> to vector<16x32xf32>
    %127 = arith.subf %114, %126 : vector<16x32xf32>
    %cst_19 = arith.constant 9.99999974E-6 : f32
    %128 = vector.broadcast %cst_19 : f32 to vector<16x1xf32>
    %129 = arith.addf %125, %128 : vector<16x1xf32>
    %130 = math.rsqrt %129 : vector<16x1xf32>
    %131 = vector.broadcast %130 : vector<16x1xf32> to vector<16x32xf32>
    %132 = arith.mulf %127, %131 : vector<16x32xf32>
    %c0_20 = arith.constant 0 : index
    %c0_21 = arith.constant 0 : index
    %133 = vector.load %arg2[%c0_20, %c0_21] : memref<32x128xf32, #tpu.memory_space<vmem>>, vector<32x128xf32>
    %cst_22 = arith.constant dense<0.000000e+00> : vector<16x128xf32>
    %134 = tpu.matmul %132, %133, %cst_22 {dimension_numbers = #tpu.dot_dimension_numbers<[1], [0], [0], [1], [0, 0, 1, 1], [], []>} : vector<16x32xf32>, vector<32x128xf32>, vector<16x128xf32> -> vector<16x128xf32>
    %c0_23 = arith.constant 0 : index
    %c0_24 = arith.constant 0 : index
    %135 = vector.load %arg3[%c0_23, %c0_24] : memref<1x128xf32, #tpu.memory_space<vmem>>, vector<1x128xf32>
    %136 = vector.broadcast %135 : vector<1x128xf32> to vector<16x128xf32>
    %137 = arith.addf %134, %136 : vector<16x128xf32>
    %cst_25 = arith.constant 0.000000e+00 : f32
    %138 = vector.broadcast %cst_25 : f32 to vector<16x128xf32>
    %139 = arith.maximumf %137, %138 : vector<16x128xf32>
    %c0_26 = arith.constant 0 : index
    %c0_27 = arith.constant 0 : index
    %140 = vector.load %arg4[%c0_26, %c0_27] : memref<128x32xf32, #tpu.memory_space<vmem>>, vector<128x32xf32>
    %cst_28 = arith.constant dense<0.000000e+00> : vector<16x32xf32>
    %141 = tpu.matmul %139, %140, %cst_28 {dimension_numbers = #tpu.dot_dimension_numbers<[1], [0], [0], [1], [0, 0, 1, 1], [], []>} : vector<16x128xf32>, vector<128x32xf32>, vector<16x32xf32> -> vector<16x32xf32>
    %c0_29 = arith.constant 0 : index
    %c0_30 = arith.constant 0 : index
    %142 = vector.load %arg5[%c0_29, %c0_30] : memref<1x32xf32, #tpu.memory_space<vmem>>, vector<1x32xf32>
    %143 = vector.broadcast %142 : vector<1x32xf32> to vector<16x32xf32>
    %144 = arith.addf %141, %143 : vector<16x32xf32>
    %145 = arith.addf %114, %144 : vector<16x32xf32>
    %c0_31 = arith.constant 0 : index
    %c0_32 = arith.constant 0 : index
    %146 = vector.load %arg6[%c0_31, %c0_32] : memref<16x32xf32, #tpu.memory_space<vmem>>, vector<16x32xf32>
    tpu.vector_store %arg6[%c0_31, %c0_32], %145 {strides = array<i32>} : memref<16x32xf32, #tpu.memory_space<vmem>>, vector<16x32xf32>,
    return
  }
}

</mosaic_0001>

<bundles_post_ra>
// kernel: gpt_forward.4
= control target key start
LH: loop header
LB: loop body
LE: loop exit
PB: predicated region body
PF: predicated region fallthrough
CT: control target
= control target key end

     0   :  { %v101_v0 = vmov 0   ;;  %v16_v19 = vlaneseq  ;;  %v102_v22 = vmov 1.0   ;;  %vm71_vm2 = vcmask 261120   ;;  %s189_s0 = inlined_call_operand.vmem [shape: s32[16,1], index: 0, kind: input, shape index: {}]   ;;  %s190_s1 = inlined_call_operand.vmem [shape: f32[128,32], index: 1, kind: input, shape index: {}]   ;;  %s191_s2 = inlined_call_operand.vmem [shape: f32[16,32], index: 2, kind: input, shape index: {}]   ;;  %s192_s3 = inlined_call_operand.vmem [shape: f32[16,32], index: 3, kind: output, shape index: {}]  }
   0x1   :  { %100 = vset.pattern.permute.xlu0 %v101_v0  ;;  %v14_v1 = vld [vmem:[%s189_s0] sm:$0xff]  ;;  %v45_v2 = vld [vmem:[%s190_s1 + $0x78] sm:$0xff]  ;;  %v44_v3 = vld [vmem:[%s190_s1 + $0x70] sm:$0xff] }
   0x2   :  { %19 = vperm.xlu0 %100, %v14_v1   ;;  %48 = vmatpush.msra.mxu0 %v45_v2  ;;  %v43_v4 = vld [vmem:[%s190_s1 + $0x68] sm:$0xff]  ;;  %v42_v5 = vld [vmem:[%s190_s1 + $0x60] sm:$0xff]  ;;  %v41_v7 = vld [vmem:[%s190_s1 + $0x58] sm:$0xff]  ;;  %v17_v20 = vand.u32 127, %v16_v19 }
   0x3   :  { %82 = vmatpush.msra.mxu1 %v45_v2  ;;  %v15_v6 = vld [vmem:[%s189_s0 + $0x8] sm:$0xff]  ;;  %v40_v8 = vld [vmem:[%s190_s1 + $0x50] sm:$0xff]  ;;  %v38_v10 = vld [vmem:[%s190_s1 + $0x40] sm:$0xff] }
   0x4   :  { %49 = vmatpush.msra.mxu0 %v44_v3  ;;  %v39_v9 = vld [vmem:[%s190_s1 + $0x48] sm:$0xff]  ;;  %v37_v11 = vld [vmem:[%s190_s1 + $0x38] sm:$0xff]  ;;  %v36_v12 = vld [vmem:[%s190_s1 + $0x30] sm:$0xff] }
   0x5   :  { %83 = vmatpush.msra.mxu1 %v44_v3  ;;  %v35_v13 = vld [vmem:[%s190_s1 + $0x28] sm:$0xff]  ;;  %v34_v14 = vld [vmem:[%s190_s1 + $0x20] sm:$0xff]  ;;  %v33_v15 = vld [vmem:[%s190_s1 + $0x18] sm:$0xff] }
   0x6   :  { %50 = vmatpush.msra.mxu0 %v43_v4  ;;  %v32_v16 = vld [vmem:[%s190_s1 + $0x10] sm:$0xff]  ;;  %v31_v17 = vld [vmem:[%s190_s1 + $0x8] sm:$0xff]  ;;  %v30_v18 = vld [vmem:[%s190_s1] sm:$0xff] }
   0x7   :  { %84 = vmatpush.msra.mxu1 %v43_v4  ;;  %v46_v24 = vld [vmem:[%s191_s2] sm:$0xff]  ;;  %v47_v27 = vld [vmem:[%s191_s2 + $0x8] sm:$0xff] }
   0x8   :  { %51 = vmatpush.msra.mxu0 %v42_v5 }
   0x9   :  { %85 = vmatpush.msra.mxu1 %v42_v5 }
   0xa   :  { %22 = vperm.xlu0 %100, %v15_v6   ;;  %52 = vmatpush.msra.mxu0 %v41_v7 }
   0xb   :  { %86 = vmatpush.msra.mxu1 %v41_v7 }
   0xc   :  { %53 = vmatpush.msra.mxu0 %v40_v8 }
   0xd   :  { %87 = vmatpush.msra.mxu1 %v40_v8 }
   0xe   :  { %54 = vmatpush.msra.mxu0 %v39_v9 }
   0xf   :  { %88 = vmatpush.msra.mxu1 %v39_v9 }
  0x10   :  { %55 = vmatpush.msra.mxu0 %v38_v10 }
  0x11   :  { %89 = vmatpush.msra.mxu1 %v38_v10 }
  0x12   :  { %56 = vmatpush.msra.mxu0 %v37_v11 }
  0x13   :  { %90 = vmatpush.msra.mxu1 %v37_v11 }
  0x14   :  { %57 = vmatpush.msra.mxu0 %v36_v12 }
  0x15   :  { %91 = vmatpush.msra.mxu1 %v36_v12 }
  0x16   :  { %58 = vmatpush.msra.mxu0 %v35_v13 }
  0x17   :  { %92 = vmatpush.msra.mxu1 %v35_v13 }
  0x18   :  { %59 = vmatpush.msra.mxu0 %v34_v14 }
  0x19   :  { %93 = vmatpush.msra.mxu1 %v34_v14 }
  0x1a   :  { %60 = vmatpush.msra.mxu0 %v33_v15 }
  0x1b   :  { %94 = vmatpush.msra.mxu1 %v33_v15 }
  0x1c   :  { %61 = vmatpush.msra.mxu0 %v32_v16 }
  0x1d   :  { %95 = vmatpush.msra.mxu1 %v32_v16 }
  0x1e   :  { %62 = vmatpush.msra.mxu0 %v31_v17 }
  0x1f   :  { %96 = vmatpush.msra.mxu1 %v31_v17 }
  0x20   :  { %63 = vmatpush.msra.mxu0 %v30_v18 }
  0x21   :  { %97 = vmatpush.msra.mxu1 %v30_v18 }
  0x74   :  { %v20_v21 = vpop.permute.xlu0 %19 }
  0x75   :  { %vm24_vm0 = vcmp.eq.s32.totalorder %v20_v21, %v17_v20 }
  0x76   :  { %80 = vmatmul.msk.f32.vlgmr.msra.gmra.mxu0 %vm24_vm0, %v102_v22 }
  0x7c   :  { %v23_v23 = vpop.permute.xlu0 %22 }
  0x7d   :  { %vm25_vm1 = vcmp.eq.s32.totalorder %v23_v23, %v17_v20 }
  0x7e   :  { %81 = vmatmul.msk.f32.vlgmr.msra.gmra.mxu1 %vm25_vm1, %v102_v22 }
  0xf3   :  { %v65_v25 = vpop.f32.mrf.mxu0 }
  0xf4   :  { %v66_v26 = vadd.f32 %v65_v25, %v46_v24 }
  0xf6   :  { %72 = vst.msk [vmem:[%s192_s3] sm:$0xff] %vm71_vm2, %v66_v26 }
  0xfb   :  { %v68_v28 = vpop.f32.mrf.mxu1 }
  0xfc   :  { %v69_v29 = vadd.f32 %v68_v28, %v47_v27 }
  0xfe   :  { %73 = vst.msk [vmem:[%s192_s3 + $0x8] sm:$0xff] %vm71_vm2, %v69_v29 }

// kernel: gpt_forward.7
= control target key start
LH: loop header
LB: loop body
LE: loop exit
PB: predicated region body
PF: predicated region fallthrough
CT: control target
= control target key end

     0   :  { %vm17_vm0 = vcmask 261120   ;;  %s216_s0 = inlined_call_operand.vmem [shape: f32[16,32], index: 0, kind: input, shape index: {}]   ;;  %s217_s1 = inlined_call_operand.vmem [shape: f32[32,128], index: 1, kind: input, shape index: {}]   ;;  %s218_s2 = inlined_call_operand.vmem [shape: f32[1,128], index: 2, kind: input, shape index: {}]   ;;  %s219_s3 = inlined_call_operand.hbm [shape: f32[16,128], index: 3, kind: output, shape index: {}]  }
   0x1   :  { %v15_v0 = vld [vmem:[%s216_s0] sm:$0xff] }
   0x2   :  { %v18_v1 = vsel %vm17_vm0, %v15_v0, 0.0  ;;  %v24_v2 = vmul.f32 %v15_v0, %v15_v0 }
   0x3   :  { %8 = vsyncpa [#allocation3], 0  ;;  %19 = vadd.xlane.f32.xlu0 %v18_v1  ;;  %v16_v4 = vld [vmem:[%s216_s0 + $0x8] sm:$0xff]  ;;  %v69_v8 = vld [vmem:[%s217_s1 + $0x18] sm:$0xff]  ;;  %s163_s24 = smov [#allocation2]   ;;  %s111_s28 = sshll.u32 %s219_s3, 4  ;;  %s112_s28 = int_to_ptr.hbm [resolvable:$true] %s111_s28 }
   0x4   :  { %v26_v3 = vsel %vm17_vm0, %v24_v2, 0.0  ;;  %v25_v5 = vmul.f32 %v16_v4, %v16_v4  ;;  %v21_v6 = vsel %vm17_vm0, %v16_v4, 0.0  ;;  %92 = vmatpush.msra.mxu0 %v69_v8  ;;  %125 = vmatpush.msra.mxu1 %v69_v8  ;;  %v68_v9 = vld [vmem:[%s217_s1 + $0x10] sm:$0xff]  ;;  %v67_v10 = vld [vmem:[%s217_s1 + $0x8] sm:$0xff]  ;;  %v66_v11 = vld [vmem:[%s217_s1] sm:$0xff]  ;;  %s109_s25 = sshll.u32 %s163_s24, 4  ;;  %s110_s25 = int_to_ptr.vmem [resolvable:$true] %s109_s25 }
   0x5   :  { %27 = vadd.xlane.f32.xlu1 %v26_v3  ;;  %v132_v44 = vld [vmem:[%s218_s2] ss:$0 sm:$0xff]  ;;  %s164_s29 = smov 128   ;;  %s165_s30 = smov 8  }
   0x6   :  { %v29_v7 = vsel %vm17_vm0, %v25_v5, 0.0  ;;  %93 = vmatpush.msra.mxu0 %v68_v9  ;;  %126 = vmatpush.msra.mxu1 %v68_v9 }
   0x8   :  { %94 = vmatpush.msra.mxu0 %v67_v10  ;;  %127 = vmatpush.msra.mxu1 %v67_v10 }
   0xa   :  { %95 = vmatpush.msra.mxu0 %v66_v11  ;;  %128 = vmatpush.msra.mxu1 %v66_v11 }
   0xb   :  { %22 = vadd.xlane.f32.xlu0 %v21_v6 }
   0xd   :  { %30 = vadd.xlane.f32.xlu1 %v29_v7 }
  0x76   :  { %v20_v12 = vpop.xlane.xlu0 %19 }
  0x77   :  { %v32_v13 = vmul.f32 0.03125, %v20_v12 }
  0x78   :  { %v28_v14 = vpop.xlane.xlu1 %27 }
  0x79   :  { %v34_v15 = vmul.f32 %v32_v13, %v20_v12  ;;  %v40_v34 = vsub.f32 %v15_v0, %v32_v13 }
  0x7b   :  { %v36_v16 = vsub.f32 %v28_v14, %v34_v15 }
  0x7d   :  { %v38_v17 = vmul.f32 0.032258064, %v36_v16 }
  0x7e   :  { %v23_v18 = vpop.xlane.xlu0 %22 }
  0x7f   :  { %v42_v19 = vadd.f32 1e-05, %v38_v17  ;;  %v33_v20 = vmul.f32 0.03125, %v23_v18 }
  0x80   :  { %v31_v21 = vpop.xlane.xlu1 %30 }
  0x81   :  { %133 = vrsqrt.f32 %v42_v19  ;;  %v35_v22 = vmul.f32 %v33_v20, %v23_v18  ;;  %vm50_vm2 = vweird.f32 %v42_v19  ;;  %v41_v41 = vsub.f32 %v16_v4, %v33_v20 }
  0x83   :  { %v37_v23 = vsub.f32 %v31_v21, %v35_v22 }
  0x85   :  { %v39_v24 = vmul.f32 0.032258064, %v37_v23 }
  0x87   :  { %v134_v25 = vpop.eup %133  ;;  %v43_v26 = vadd.f32 1e-05, %v39_v24 }
  0x88   :  { %v45_v27 = vmul.f32 %v134_v25, %v42_v19  ;;  %vm51_vm1 = vweird.f32 %v134_v25 }
  0x89   :  { %135 = vrsqrt.f32 %v43_v26  ;;  %vm52_vm3 = vmor %vm50_vm2, %vm51_vm1  ;;  %vm60_vm5 = vweird.f32 %v43_v26 }
  0x8a   :  { %v46_v28 = vmul.f32 %v134_v25, %v45_v27 }
  0x8c   :  { %v47_v29 = vmul.f32 0.5, %v46_v28 }
  0x8e   :  { %v48_v30 = vsub.f32 1.5, %v47_v29 }
  0x8f   :  { %v136_v31 = vpop.eup %135 }
  0x90   :  { %v55_v32 = vmul.f32 %v136_v31, %v43_v26  ;;  %v49_v33 = vmul.f32 %v134_v25, %v48_v30  ;;  %vm61_vm4 = vweird.f32 %v136_v31 }
  0x91   :  { %vm62_vm6 = vmor %vm60_vm5, %vm61_vm4 }
  0x92   :  { %v56_v35 = vmul.f32 %v136_v31, %v55_v32  ;;  %v53_v36 = vsel %vm52_vm3, %v134_v25, %v49_v33 }
  0x93   :  { %v64_v37 = vmul.f32 %v53_v36, %v40_v34 }
  0x94   :  { %v57_v38 = vmul.f32 0.5, %v56_v35 }
  0x95   :  { %123 = vmatmul.msk.f32.vlgmr.msra.gmra.mxu0 %vm17_vm0, %v64_v37 }
  0x96   :  { %v58_v39 = vsub.f32 1.5, %v57_v38 }
  0x98   :  { %v59_v40 = vmul.f32 %v136_v31, %v58_v39 }
  0x9a   :  { %v63_v42 = vsel %vm62_vm6, %v136_v31, %v59_v40 }
  0x9b   :  { %v65_v43 = vmul.f32 %v63_v42, %v41_v41 }
  0x9d   :  { %124 = vmatmul.msk.f32.vlgmr.msra.gmra.mxu1 %vm17_vm0, %v65_v43 }
 0x112   :  { %v97_v45 = vpop.f32.mrf.mxu0 }
 0x113   :  { %v98_v46 = vadd.f32 %v132_v44, %v97_v45 }
 0x115   :  { %103 = vst [vmem:[#allocation2] sm:$0xff] %v98_v46 }
 0x11a   :  { %v100_v47 = vpop.f32.mrf.mxu1 }
 0x11b   :  { %v101_v48 = vadd.f32 %v132_v44, %v100_v47 }
 0x11d   :  { %104 = vst [vmem:[#allocation2 + $0x8] sm:$0xff] %v101_v48 }
 0x11e   :  { %117 = dma.vmem_to_hbm [thread:$0]  %s110_s25, 256, %s112_s28, [#allocation3], %s164_s29, %s164_s29, %s165_s30  }
 0x11f   :  { %161 = dma.done.wait [#allocation3], 256  }
 0x120   :  { %162 = vsyncadd [#allocation3], 4294967040 }
 0x121   :  { %122 = vsyncpa [#allocation3], 1 }

// kernel: gpt_forward.5
= control target key start
LH: loop header
LB: loop body
LE: loop exit
PB: predicated region body
PF: predicated region fallthrough
CT: control target
= control target key end

     0   :  { %vm25_vm0 = vcmask 261120   ;;  %s1023_s8 = smov 120   ;;  %s1024_s9 = smov 96   ;;  %vm128_vm7 = vcmask 64512   ;;  %v121_v60 = vlaneseq  ;;  %s1417_s0 = inlined_call_operand.vmem [shape: f32[16,32], index: 0, kind: input, shape index: {}]   ;;  %s1418_s1 = inlined_call_operand.vmem [shape: f32[32,96], index: 1, kind: input, shape index: {}]   ;;  %s1419_s3 = inlined_call_operand.vmem [shape: f32[1,128], index: 3, kind: input, shape index: {}]   ;;  %s1420_s2 = inlined_call_operand.vmem [shape: f32[32,128], index: 2, kind: input, shape index: {}]   ;;  %s1421_s4 = inlined_call_operand.vmem [shape: f32[128,32], index: 4, kind: input, shape index: {}]   ;;  %s1422_s5 = inlined_call_operand.vmem [shape: f32[1,32], index: 5, kind: input, shape index: {}]   ;;  %s1423_s6 = inlined_call_operand.vmem [shape: f32[16,32], index: 6, kind: output, shape index: {}]  }
   0x1   :  { %v1068_v0 = vld [vmem:[%s1417_s0 + $0x8] sm:$0xff]  ;;  %v1073_v1 = vld [vmem:[%s1417_s0] sm:$0xff]  ;;  %v77_v8 = vld [vmem:[%s1418_s1 + $0x18] sm:$0xff]  ;;  %s1025_s10 = smov 112   ;;  %s1026_s11 = smov 64  }
   0x2   :  { %v29_v2 = vsel %vm25_vm0, %v1068_v0, 0.0  ;;  %v26_v3 = vsel %vm25_vm0, %v1073_v1, 0.0  ;;  %v33_v4 = vmul.f32 %v1068_v0, %v1068_v0  ;;  %v32_v5 = vmul.f32 %v1073_v1, %v1073_v1  ;;  %96 = vmatpush.msra.mxu1 %v77_v8  ;;  %953 = vmatpush.msra.mxu2 %v77_v8  ;;  %v76_v9 = vld [vmem:[%s1418_s1 + $0x10] sm:$0xff]  ;;  %v75_v10 = vld [vmem:[%s1418_s1 + $0x8] sm:$0xff]  ;;  %v74_v13 = vld [vmem:[%s1418_s1] sm:$0xff]  ;;  %s1022_s1 = smov 104  }
   0x3   :  { %30 = vadd.xlane.f32.xlu1 %v29_v2  ;;  %27 = vadd.xlane.f32.xlu0 %v26_v3  ;;  %v122_v61 = vshrl.u32 %v121_v60, 7  ;;  %v124_v62 = vand.u32 127, %v121_v60  ;;  %s1027_s12 = smov 8   ;;  %s1028_s13 = smov 16  }
   0x4   :  { %v37_v6 = vsel %vm25_vm0, %v33_v4, 0.0  ;;  %v34_v7 = vsel %vm25_vm0, %v32_v5, 0.0  ;;  %97 = vmatpush.msra.mxu1 %v76_v9  ;;  %954 = vmatpush.msra.mxu2 %v76_v9  ;;  %s1029_s14 = smov 24  }
   0x5   :  { %vm1155_vm8 = vcmp.le.s32.totalorder %v124_v62, %v122_v61 }
   0x6   :  { %98 = vmatpush.msra.mxu1 %v75_v10  ;;  %955 = vmatpush.msra.mxu2 %v75_v10 }
   0x8   :  { %99 = vmatpush.msra.mxu1 %v74_v13  ;;  %956 = vmatpush.msra.mxu2 %v74_v13 }
   0xb   :  { %38 = vadd.xlane.f32.xlu1 %v37_v6  ;;  %35 = vadd.xlane.f32.xlu0 %v34_v7 }
  0x76   :  { %v31_v11 = vpop.xlane.xlu1 %30  ;;  %v28_v12 = vpop.xlane.xlu0 %27 }
  0x77   :  { %v41_v14 = vmul.f32 0.03125, %v31_v11  ;;  %v40_v15 = vmul.f32 0.03125, %v28_v12 }
  0x79   :  { %v43_v16 = vmul.f32 %v41_v14, %v31_v11  ;;  %v42_v17 = vmul.f32 %v40_v15, %v28_v12  ;;  %v49_v37 = vsub.f32 %v1068_v0, %v41_v14  ;;  %v48_v39 = vsub.f32 %v1073_v1, %v40_v15 }
  0x7e   :  { %v39_v18 = vpop.xlane.xlu1 %38  ;;  %v36_v19 = vpop.xlane.xlu0 %35 }
  0x7f   :  { %v45_v20 = vsub.f32 %v39_v18, %v43_v16  ;;  %v44_v21 = vsub.f32 %v36_v19, %v42_v17 }
  0x81   :  { %v47_v22 = vmul.f32 0.032258064, %v45_v20  ;;  %v46_v23 = vmul.f32 0.032258064, %v44_v21 }
  0x83   :  { %v51_v24 = vadd.f32 1e-05, %v47_v22  ;;  %v50_v25 = vadd.f32 1e-05, %v46_v23 }
  0x85   :  { %982 = vrsqrt.f32 %v51_v24  ;;  %vm68_vm1 = vweird.f32 %v51_v24  ;;  %vm58_vm5 = vweird.f32 %v50_v25 }
  0x86   :  { %984 = vrsqrt.f32 %v50_v25 }
  0x8b   :  { %v983_v26 = vpop.eup %982 }
  0x8c   :  { %v985_v27 = vpop.eup %984  ;;  %v63_v28 = vmul.f32 %v983_v26, %v51_v24  ;;  %vm69_vm2 = vweird.f32 %v983_v26 }
  0x8d   :  { %v53_v29 = vmul.f32 %v985_v27, %v50_v25  ;;  %vm70_vm3 = vmor %vm68_vm1, %vm69_vm2  ;;  %vm59_vm4 = vweird.f32 %v985_v27 }
  0x8e   :  { %v64_v30 = vmul.f32 %v983_v26, %v63_v28  ;;  %vm60_vm6 = vmor %vm58_vm5, %vm59_vm4 }
  0x8f   :  { %v54_v31 = vmul.f32 %v985_v27, %v53_v29 }
  0x90   :  { %v65_v32 = vmul.f32 0.5, %v64_v30 }
  0x91   :  { %v55_v33 = vmul.f32 0.5, %v54_v31 }
  0x92   :  { %v66_v34 = vsub.f32 1.5, %v65_v32 }
  0x93   :  { %v56_v35 = vsub.f32 1.5, %v55_v33 }
  0x94   :  { %v67_v36 = vmul.f32 %v983_v26, %v66_v34 }
  0x95   :  { %v57_v38 = vmul.f32 %v985_v27, %v56_v35 }
  0x96   :  { %v71_v40 = vsel %vm70_vm3, %v983_v26, %v67_v36 }
  0x97   :  { %v61_v41 = vsel %vm60_vm6, %v985_v27, %v57_v38  ;;  %v73_v42 = vmul.f32 %v71_v40, %v49_v37 }
  0x98   :  { %v72_v43 = vmul.f32 %v61_v41, %v48_v39 }
  0x99   :  { %926 = vmatmul.msk.f32.vlgmr.msra.gmra.mxu2 %vm25_vm0, %v73_v42 }
  0x9a   :  { %925 = vmatmul.msk.f32.vlgmr.msra.gmra.mxu1 %vm25_vm0, %v72_v43 }
 0x117   :  { %v1101_v44 = vpop.f32.mrf.mxu1 }
 0x118   :  { %112 = vrot.lane.b32.xlu0 %v1101_v44, %s1022_s1  ;;  %108 = vrot.lane.b32.xlu2 %v1101_v44, %s1023_s8 }
 0x11c   :  { %v1105_v45 = vpop.f32.mrf.mxu2 }
 0x11d   :  { %119 = vrot.lane.b32.xlu1 %v1105_v45, %s1022_s1 }
 0x120   :  { %126 = vrot.lane.b32.xlu0 %v1101_v44, %s1024_s9  ;;  %110 = vrot.lane.b32.xlu2 %v1101_v44, %s1025_s10 }
 0x128   :  { %115 = vrot.lane.b32.xlu2 %v1105_v45, %s1023_s8 }
 0x130   :  { %117 = vrot.lane.b32.xlu2 %v1105_v45, %s1025_s10 }
 0x172   :  { %v1112_v46 = vpop.permute.xlu2 %108 }
 0x173   :  { %153 = vrot.lane.b32.xlu2 %v1112_v46, %s1024_s9 }
 0x17a   :  { %v1115_v47 = vpop.permute.xlu2 %110 }
 0x17b   :  { %231 = vrot.lane.b32.xlu2 %v1105_v45, %s1024_s9  ;;  %179 = vrot.lane.b32.xlu1 %v1115_v47, %s1024_s9 }
 0x182   :  { %v1119_v48 = vpop.permute.xlu2 %115 }
 0x183   :  { %257 = vrot.lane.b32.xlu1 %v1119_v48, %s1024_s9 }
 0x18a   :  { %v1122_v49 = vpop.permute.xlu0 %112  ;;  %v1128_v51 = vpop.permute.xlu2 %117 }
 0x18b   :  { %205 = vrot.lane.b32.xlu0 %v1122_v49, %s1024_s9 }
 0x18f   :  { %v1125_v50 = vpop.permute.xlu1 %119 }
 0x190   :  { %309 = vrot.lane.b32.xlu2 %v1125_v50, %s1024_s9 }
 0x192   :  { %v127_v52 = vpop.permute.xlu0 %126 }
 0x193   :  { %927 = vmatpush.xpose.msk.msrb.mxu1 %vm128_vm7, %v127_v52  ;;  %283 = vrot.lane.b32.xlu0 %v1128_v51, %s1024_s9 }
 0x196   :  { %928 = vmatmul.msk.f32.vlgmr.msrb.gmra.mxu1 %vm128_vm7, %v1101_v44 }
 0x1cd   :  { %v154_v53 = vpop.permute.xlu2 %153 }
 0x1ce   :  { %929 = vmatpush.xpose.msk.msrb.mxu2 %vm128_vm7, %v154_v53 }
 0x1d1   :  { %930 = vmatmul.msk.f32.vlgmr.msrb.gmra.mxu2 %vm128_vm7, %v1112_v46 }
 0x1d5   :  { %v232_v54 = vpop.permute.xlu2 %231 }
 0x1d6   :  { %935 = vmatpush.xpose.msk.msra.mxu2 %vm128_vm7, %v232_v54 }
 0x1d9   :  { %936 = vmatmul.msk.f32.vlgmr.msra.gmra.mxu2 %vm128_vm7, %v1105_v45 }
 0x1ea   :  { %v310_v55 = vpop.permute.xlu2 %309 }
 0x1eb   :  { %941 = vmatpush.xpose.msk.msrb.mxu2 %vm128_vm7, %v310_v55 }
 0x1ed   :  { %v180_v56 = vpop.permute.xlu1 %179 }
 0x1ee   :  { %931 = vmatpush.xpose.msk.msra.mxu3 %vm128_vm7, %v180_v56  ;;  %942 = vmatmul.msk.f32.vlgmr.msrb.gmra.mxu2 %vm128_vm7, %v1125_v50 }
 0x1f1   :  { %932 = vmatmul.msk.f32.vlgmr.msra.gmra.mxu3 %vm128_vm7, %v1115_v47 }
 0x1f5   :  { %v258_v57 = vpop.permute.xlu1 %257 }
 0x1f6   :  { %937 = vmatpush.xpose.msk.msrb.mxu3 %vm128_vm7, %v258_v57 }
 0x1f9   :  { %938 = vmatmul.msk.f32.vlgmr.msrb.gmra.mxu3 %vm128_vm7, %v1119_v48 }
 0x1fd   :  { %v206_v58 = vpop.permute.xlu0 %205 }
 0x1fe   :  { %933 = vmatpush.xpose.msk.msra.mxu1 %vm128_vm7, %v206_v58 }
 0x201   :  { %934 = vmatmul.msk.f32.vlgmr.msra.gmra.mxu1 %vm128_vm7, %v1122_v49 }
 0x205   :  { %v284_v59 = vpop.permute.xlu0 %283 }
 0x206   :  { %939 = vmatpush.xpose.msk.msrb.mxu1 %vm128_vm7, %v284_v59 }
 0x209   :  { %940 = vmatmul.msk.f32.vlgmr.msrb.gmra.mxu1 %vm128_vm7, %v1128_v51 }
 0x213   :  { %v150_v8 = vpop.f32.mrf.mxu1 }
 0x214   :  { %v335_v31 = vmul.f32 0.17677669, %v150_v8 }
 0x216   :  { %v345_v32 = vsel %vm1155_vm8, %v335_v31, -1e+30 }
 0x217   :  { %v353_v33 = vsel %vm128_vm7, %v345_v32, -inf }
 0x254   :  { %v176_v63 = vpop.f32.mrf.mxu2 }
 0x255   :  { %v336_v2 = vmul.f32 0.17677669, %v176_v63 }
 0x257   :  { %v346_v4 = vsel %vm1155_vm8, %v336_v2, -1e+30 }
 0x258   :  { %v356_v5 = vsel %vm128_vm7, %v346_v4, -inf }
 0x259   :  { %357 = vmax.xlane.f32.xlu1 %v356_v5 }
 0x25c   :  { %v254_v10 = vpop.f32.mrf.mxu2 }
 0x25d   :  { %v339_v19 = vmul.f32 0.17677669, %v254_v10  ;;  %v970_v10 = vpack.i.bf16 %v1125_v50, %v1115_v47 }
 0x25f   :  { %v1173_v23 = vsel %vm1155_vm8, %v339_v19, -1e+30 }
 0x260   :  { %v365_v27 = vsel %vm128_vm7, %v1173_v23, -inf }
 0x271   :  { %v332_v17 = vpop.f32.mrf.mxu2 }
 0x272   :  { %v342_v22 = vmul.f32 0.17677669, %v332_v17 }
 0x274   :  { %v202_v6 = vpop.f32.mrf.mxu3  ;;  %v352_v26 = vsel %vm1155_vm8, %v342_v22, -1e+30 }
 0x275   :  { %v337_v7 = vmul.f32 0.17677669, %v202_v6  ;;  %v374_v30 = vsel %vm128_vm7, %v352_v26, -inf }
 0x277   :  { %v347_v9 = vsel %vm1155_vm8, %v337_v7, -1e+30 }
 0x278   :  { %v359_v11 = vsel %vm128_vm7, %v347_v9, -inf }
 0x279   :  { %360 = vmax.xlane.f32.xlu0 %v359_v11  ;;  %v965_v11 = vpack.i.bf16 %v1112_v46, %v1122_v49 }
 0x27c   :  { %v280_v12 = vpop.f32.mrf.mxu3 }
 0x27d   :  { %v340_v13 = vmul.f32 0.17677669, %v280_v12  ;;  %v975_v12 = vpack.i.bf16 %v1128_v51, %v1119_v48 }
 0x27e   :  { %v228_v14 = vpop.f32.mrf.mxu1 }
 0x27f   :  { %v338_v15 = vmul.f32 0.17677669, %v228_v14  ;;  %v350_v16 = vsel %vm1155_vm8, %v340_v13, -1e+30 }
 0x280   :  { %v368_v18 = vsel %vm128_vm7, %v350_v16, -inf }
 0x281   :  { %369 = vmax.xlane.f32.xlu1 %v368_v18  ;;  %v348_v20 = vsel %vm1155_vm8, %v338_v15, -1e+30 }
 0x282   :  { %v362_v21 = vsel %vm128_vm7, %v348_v20, -inf }
 0x283   :  { %363 = vmax.xlane.f32.xlu2 %v362_v21 }
 0x286   :  { %v306_v24 = vpop.f32.mrf.mxu1 }
 0x287   :  { %v341_v25 = vmul.f32 0.17677669, %v306_v24 }
 0x289   :  { %366 = vmax.xlane.f32.xlu1 %v365_v27  ;;  %v351_v28 = vsel %vm1155_vm8, %v341_v25, -1e+30 }
 0x28a   :  { %v371_v29 = vsel %vm128_vm7, %v351_v28, -inf }
 0x28b   :  { %372 = vmax.xlane.f32.xlu0 %v371_v29  ;;  %375 = vmax.xlane.f32.xlu2 %v374_v30 }
 0x293   :  { %354 = vmax.xlane.f32.xlu2 %v353_v33 }
 0x2cc   :  { %v358_v34 = vpop.xlane.xlu1 %357 }
 0x2cd   :  { %v378_v35 = vsub.f32 %v346_v4, %v358_v34 }
 0x2cf   :  { %v387_v36 = vmul.f32 1.442695, %v378_v35 }
 0x2d1   :  { %986 = vpow2.f32 %v387_v36 }
 0x2d7   :  { %v1186_v37 = vpop.eup %986 }
 0x2d8   :  { %v404_v38 = vsel %vm128_vm7, %v1186_v37, 0.0 }
 0x2d9   :  { %405 = vadd.xlane.f32.xlu2 %v404_v38 }
 0x2ec   :  { %v361_v39 = vpop.xlane.xlu0 %360 }
 0x2ed   :  { %v379_v40 = vsub.f32 %v347_v9, %v361_v39 }
 0x2ef   :  { %v389_v41 = vmul.f32 1.442695, %v379_v40 }
 0x2f1   :  { %988 = vpow2.f32 %v389_v41 }
 0x2f4   :  { %v370_v42 = vpop.xlane.xlu1 %369 }
 0x2f5   :  { %v382_v43 = vsub.f32 %v350_v16, %v370_v42 }
 0x2f6   :  { %v364_v52 = vpop.xlane.xlu2 %363 }
 0x2f7   :  { %v1190_v53 = vpop.eup %988  ;;  %v395_v54 = vmul.f32 1.442695, %v382_v43  ;;  %v380_v55 = vsub.f32 %v348_v20, %v364_v52 }
 0x2f8   :  { %v407_v56 = vsel %vm128_vm7, %v1190_v53, 0.0 }
 0x2f9   :  { %990 = vpow2.f32 %v395_v54  ;;  %v391_v57 = vmul.f32 1.442695, %v380_v55  ;;  %408 = vadd.xlane.f32.xlu1 %v407_v56 }
 0x2fb   :  { %992 = vpow2.f32 %v391_v57 }
 0x2fc   :  { %v367_v13 = vpop.xlane.xlu1 %366 }
 0x2fd   :  { %v381_v14 = vsub.f32 %v1173_v23, %v367_v13 }
 0x2fe   :  { %v373_v58 = vpop.xlane.xlu0 %372  ;;  %v376_v59 = vpop.xlane.xlu2 %375 }
 0x2ff   :  { %v1194_v60 = vpop.eup %990  ;;  %v383_v61 = vsub.f32 %v351_v28, %v373_v58  ;;  %v384_v62 = vsub.f32 %v352_v26, %v376_v59  ;;  %v393_v15 = vmul.f32 1.442695, %v381_v14 }
 0x300   :  { %v416_v63 = vsel %vm128_vm7, %v1194_v60, 0.0 }
 0x301   :  { %v1198_v2 = vpop.eup %992  ;;  %v397_v3 = vmul.f32 1.442695, %v383_v61  ;;  %v399_v4 = vmul.f32 1.442695, %v384_v62  ;;  %417 = vadd.xlane.f32.xlu2 %v416_v63 }
 0x302   :  { %v410_v5 = vsel %vm128_vm7, %v1198_v2, 0.0 }
 0x303   :  { %994 = vpow2.f32 %v397_v3  ;;  %411 = vadd.xlane.f32.xlu0 %v410_v5 }
 0x304   :  { %996 = vpow2.f32 %v399_v4 }
 0x305   :  { %998 = vpow2.f32 %v393_v15 }
 0x306   :  { %v355_v16 = vpop.xlane.xlu2 %354 }
 0x307   :  { %v377_v47 = vsub.f32 %v345_v32, %v355_v16 }
 0x309   :  { %v1202_v6 = vpop.eup %994  ;;  %v385_v50 = vmul.f32 1.442695, %v377_v47 }
 0x30a   :  { %v1204_v7 = vpop.eup %996  ;;  %v419_v8 = vsel %vm128_vm7, %v1202_v6, 0.0 }
 0x30b   :  { %420 = vadd.xlane.f32.xlu1 %v419_v8  ;;  %v422_v9 = vsel %vm128_vm7, %v1204_v7, 0.0  ;;  %v1219_v17 = vpop.eup %998  ;;  %1000 = vpow2.f32 %v385_v50 }
 0x30c   :  { %423 = vadd.xlane.f32.xlu0 %v422_v9  ;;  %v413_v46 = vsel %vm128_vm7, %v1219_v17, 0.0 }
 0x311   :  { %v1223_v48 = vpop.eup %1000 }
 0x319   :  { %971 = vrot.lane.b32.xlu2 %v970_v10, %s1026_s11 }
 0x320   :  { %966 = vrot.lane.b32.xlu0 %v965_v11, %s1026_s11 }
 0x324   :  { %976 = vrot.lane.b32.xlu1 %v975_v12, %s1026_s11 }
 0x32c   :  { %545 = vrot.lane.b32.xlu1 %v1101_v44, %s1026_s11  ;;  %v401_v44 = vsel %vm128_vm7, %v1223_v48, 0.0 }
 0x334   :  { %649 = vrot.lane.b32.xlu1 %v1105_v45, %s1026_s11 }
 0x342   :  { %414 = vadd.xlane.f32.xlu2 %v413_v46 }
 0x34a   :  { %402 = vadd.xlane.f32.xlu0 %v401_v44 }
 0x34c   :  { %v406_v49 = vpop.xlane.xlu2 %405 }
 0x34d   :  { %v451_v52 = vand.u32 2147483648, %v406_v49  ;;  %vm445_vm14 = vweird.f32 %v406_v49  ;;  %v449_v59 = vand.u32 2147483647, %v406_v49 }
 0x34f   :  { %v452_v62 = vor.u32 1.1754944e-38, %v451_v52  ;;  %vm450_vm2 = vcmp.eq.f32.partialorder %v449_v59, 8.507059e+37 }
 0x36c   :  { %v409_v51 = vpop.xlane.xlu1 %408 }
 0x36d   :  { %1002 = vrcp.f32 %v409_v51  ;;  %v466_v23 = vand.u32 2147483648, %v409_v51  ;;  %v464_v25 = vand.u32 2147483647, %v409_v51  ;;  %vm460_vm10 = vweird.f32 %v409_v51 }
 0x36e   :  { %1004 = vrcp.f32 %v406_v49 }
 0x36f   :  { %v467_v28 = vor.u32 1.1754944e-38, %v466_v23  ;;  %vm465_vm12 = vcmp.eq.f32.partialorder %v464_v25, 8.507059e+37 }
 0x373   :  { %v1003_v45 = vpop.eup %1002 }
 0x374   :  { %v456_v18 = vmul.f32 %v1003_v45, %v409_v51  ;;  %v1227_v19 = vpop.xlane.xlu2 %417  ;;  %v1005_v20 = vpop.eup %1004  ;;  %vm461_vm9 = vweird.f32 %v1003_v45 }
 0x375   :  { %v441_v26 = vmul.f32 %v1005_v20, %v406_v49  ;;  %vm462_vm11 = vmor %vm460_vm10, %vm461_vm9  ;;  %vm446_vm13 = vweird.f32 %v1005_v20  ;;  %vm505_vm6 = vweird.f32 %v1227_v19  ;;  %v509_v49 = vand.u32 2147483647, %v1227_v19 }
 0x376   :  { %v457_v21 = vsub.f32 1.0, %v456_v18  ;;  %v1229_v22 = vpop.xlane.xlu0 %411  ;;  %vm447_vm15 = vmor %vm445_vm14, %vm446_vm13  ;;  %v511_v51 = vand.u32 2147483648, %v1227_v19 }
 0x377   :  { %1006 = vrcp.f32 %v1229_v22  ;;  %v442_v32 = vsub.f32 1.0, %v441_v26  ;;  %v481_v9 = vand.u32 2147483648, %v1229_v22  ;;  %vm475_vm3 = vweird.f32 %v1229_v22 }
 0x378   :  { %v458_v24 = vmul.f32 %v1003_v45, %v457_v21  ;;  %1008 = vrcp.f32 %v1227_v19  ;;  %v479_v10 = vand.u32 2147483647, %v1229_v22 }
 0x379   :  { %v443_v40 = vmul.f32 %v1005_v20, %v442_v32  ;;  %v482_v47 = vor.u32 1.1754944e-38, %v481_v9 }
 0x37a   :  { %v459_v27 = vadd.f32 %v1003_v45, %v458_v24  ;;  %vm480_vm8 = vcmp.eq.f32.partialorder %v479_v10, 8.507059e+37 }
 0x37b   :  { %v444_v55 = vadd.f32 %v1005_v20, %v443_v40 }
 0x37c   :  { %v463_v29 = vsel %vm462_vm11, %v1003_v45, %v459_v27  ;;  %v1233_v30 = vpop.permute.xlu2 %971 }
 0x37d   :  { %v1007_v31 = vpop.eup %1006  ;;  %v468_v33 = vsel %vm465_vm12, %v467_v28, %v463_v29  ;;  %v973_v34 = vunpack.i.l.bf16 %v1233_v30  ;;  %v448_v3 = vsel %vm447_vm15, %v1005_v20, %v444_v55 }
 0x37e   :  { %v471_v35 = vmul.f32 %v1007_v31, %v1229_v22  ;;  %v1237_v36 = vpop.xlane.xlu1 %420  ;;  %v469_v38 = vmul.f32 %v1190_v53, %v468_v33  ;;  %v1245_v41 = vpop.eup %1008  ;;  %vm476_vm1 = vweird.f32 %v1007_v31  ;;  %v453_v11 = vsel %vm450_vm2, %v452_v62, %v448_v3 }
 0x37f   :  { %1010 = vrcp.f32 %v1237_v36  ;;  %v1241_v39 = vpop.xlane.xlu0 %423  ;;  %618 = vmatpush.msra.mxu1 %v973_v34  ;;  %v501_v54 = vmul.f32 %v1245_v41, %v1227_v19  ;;  %vm1258_vm4 = vmor %vm475_vm3, %vm476_vm1  ;;  %v526_v50 = vand.u32 2147483648, %v1237_v36  ;;  %v454_v46 = vmul.f32 %v1186_v37, %v453_v11 }
 0x380   :  { %1012 = vrcp.f32 %v1241_v39  ;;  %945 = vmatmul.msk.f32.vlgmr.msra.gmra.mxu1 %vm128_vm7, %v469_v38  ;;  %v472_v42 = vsub.f32 1.0, %v471_v35  ;;  %vm520_vm9 = vweird.f32 %v1237_v36  ;;  %v524_v44 = vand.u32 2147483647, %v1237_v36 }
 0x381   :  { %v502_v63 = vsub.f32 1.0, %v501_v54  ;;  %vm506_vm10 = vweird.f32 %v1245_v41  ;;  %v527_v23 = vor.u32 1.1754944e-38, %v526_v50  ;;  %v541_v24 = vand.u32 2147483648, %v1241_v39 }
 0x382   :  { %v473_v56 = vmul.f32 %v1007_v31, %v472_v42  ;;  %vm1285_vm13 = vmor %vm505_vm6, %vm506_vm10  ;;  %vm525_vm14 = vcmp.eq.f32.partialorder %v524_v44, 8.507059e+37  ;;  %vm535_vm15 = vweird.f32 %v1241_v39  ;;  %v539_v28 = vand.u32 2147483647, %v1241_v39 }
 0x383   :  { %v503_v12 = vmul.f32 %v1245_v41, %v502_v63  ;;  %v542_v35 = vor.u32 1.1754944e-38, %v541_v24  ;;  %vm510_vm2 = vcmp.eq.f32.partialorder %v509_v49, 8.507059e+37 }
 0x384   :  { %v474_v4 = vadd.f32 %v1007_v31, %v473_v56  ;;  %vm540_vm3 = vcmp.eq.f32.partialorder %v539_v28, 8.507059e+37 }
 0x385   :  { %v1011_v43 = vpop.eup %1010  ;;  %v504_v37 = vadd.f32 %v1245_v41, %v503_v12 }
 0x386   :  { %v1249_v53 = vpop.eup %1012  ;;  %v516_v57 = vmul.f32 %v1011_v43, %v1237_v36  ;;  %v478_v14 = vsel %vm1258_vm4, %v1007_v31, %v474_v4  ;;  %vm521_vm5 = vweird.f32 %v1011_v43  ;;  %v974_v31 = vunpack.i.h.bf16 %v1233_v30 }
 0x387   :  { %v531_v58 = vmul.f32 %v1249_v53, %v1241_v39  ;;  %v483_v45 = vsel %vm480_vm8, %v482_v47, %v478_v14  ;;  %vm1273_vm11 = vmor %vm520_vm9, %vm521_vm5  ;;  %vm536_vm12 = vweird.f32 %v1249_v53  ;;  %v512_v30 = vor.u32 1.1754944e-38, %v511_v51 }
 0x388   :  { %v517_v61 = vsub.f32 1.0, %v516_v57  ;;  %v484_v29 = vmul.f32 %v1198_v2, %v483_v45  ;;  %vm1293_vm1 = vmor %vm535_vm15, %vm536_vm12  ;;  %v508_v2 = vsel %vm1285_vm13, %v1245_v41, %v504_v37  ;;  %vm766_vm13 = vcmask 130048  }
 0x389   :  { %v532_v8 = vsub.f32 1.0, %v531_v58  ;;  %v513_v42 = vsel %vm510_vm2, %v512_v30, %v508_v2  ;;  %v838_v30 = vld [vmem:[%s1420_s2 + $0x18] sm:$0xff] }
 0x38a   :  { %v518_v5 = vmul.f32 %v1011_v43, %v517_v61 }
 0x38b   :  { %v533_v16 = vmul.f32 %v1249_v53, %v532_v8 }
 0x38c   :  { %v519_v15 = vadd.f32 %v1011_v43, %v518_v5 }
 0x38d   :  { %v534_v21 = vadd.f32 %v1249_v53, %v533_v16 }
 0x38e   :  { %v523_v20 = vsel %vm1273_vm11, %v1011_v43, %v519_v15  ;;  %v514_v43 = vmul.f32 %v1194_v60, %v513_v42 }
 0x38f   :  { %v528_v32 = vsel %vm525_vm14, %v527_v23, %v523_v20  ;;  %v538_v19 = vsel %vm1293_vm1, %v1249_v53, %v534_v21  ;;  %vm768_vm14 = vcmask 195584  }
 0x390   :  { %v529_v39 = vmul.f32 %v1202_v6, %v528_v32  ;;  %v543_v40 = vsel %vm540_vm3, %v542_v35, %v538_v19  ;;  %v836_v35 = vld [vmem:[%s1420_s2 + $0x8] sm:$0xff] }
 0x391   :  { %v544_v52 = vmul.f32 %v1204_v7, %v543_v40 }
 0x392   :  { %v967_v22 = vpop.permute.xlu0 %966 }
 0x393   :  { %v968_v25 = vunpack.i.l.bf16 %v967_v22  ;;  %v969_v26 = vunpack.i.h.bf16 %v967_v22 }
 0x395   :  { %592 = vmatpush.msra.mxu0 %v969_v26  ;;  %644 = vmatpush.msra.mxu2 %v968_v25 }
 0x396   :  { %944 = vmatmul.msk.f32.vlgmr.msra.gmra.mxu0 %vm128_vm7, %v454_v46  ;;  %946 = vmatmul.msk.f32.vlgmr.msra.gmra.mxu2 %vm128_vm7, %v484_v29  ;;  %v977_v34 = vpop.permute.xlu1 %976 }
 0x397   :  { %748 = vmatpush.msrb.mxu2 %v974_v31  ;;  %v979_v36 = vunpack.i.h.bf16 %v977_v34  ;;  %v978_v38 = vunpack.i.l.bf16 %v977_v34 }
 0x399   :  { %696 = vmatpush.msrb.mxu0 %v978_v38  ;;  %722 = vmatpush.msrb.mxu1 %v979_v36  ;;  %v835_v36 = vld [vmem:[%s1420_s2] sm:$0xff] }
 0x39a   :  { %949 = vmatmul.msk.f32.vlgmr.msrb.gmra.mxu1 %vm128_vm7, %v529_v39 }
 0x39e   :  { %948 = vmatmul.msk.f32.vlgmr.msrb.gmra.mxu0 %vm128_vm7, %v514_v43  ;;  %950 = vmatmul.msk.f32.vlgmr.msrb.gmra.mxu2 %vm128_vm7, %v544_v52  ;;  %v546_v41 = vpop.permute.xlu1 %545 }
 0x39f   :  { %566 = vmatpush.msra.mxu3 %v546_v41 }
 0x3a6   :  { %v650_v54 = vpop.permute.xlu1 %649 }
 0x3a7   :  { %670 = vmatpush.msrb.mxu3 %v650_v54  ;;  %v889_v54 = vld [vmem:[%s1421_s4 + $0x78] sm:$0xff] }
 0x3a8   :  { %894 = vmatpush.msra.mxu0 %v889_v54 }
 0x3b5   :  { %v415_v55 = vpop.xlane.xlu2 %414 }
 0x3b6   :  { %1014 = vrcp.f32 %v415_v55  ;;  %v496_v9 = vand.u32 2147483648, %v415_v55  ;;  %vm490_vm10 = vweird.f32 %v415_v55  ;;  %v494_v11 = vand.u32 2147483647, %v415_v55 }
 0x3b8   :  { %v497_v14 = vor.u32 1.1754944e-38, %v496_v9  ;;  %vm495_vm12 = vcmp.eq.f32.partialorder %v494_v11, 8.507059e+37 }
 0x3bc   :  { %v1015_v53 = vpop.eup %1014 }
 0x3bd   :  { %v403_v6 = vpop.xlane.xlu0 %402  ;;  %v486_v56 = vmul.f32 %v1015_v53, %v415_v55  ;;  %vm491_vm8 = vweird.f32 %v1015_v53  ;;  %v888_v55 = vld [vmem:[%s1421_s4 + $0x70] sm:$0xff] }
 0x3be   :  { %1016 = vrcp.f32 %v403_v6  ;;  %v436_v61 = vand.u32 2147483648, %v403_v6  ;;  %v434_v63 = vand.u32 2147483647, %v403_v6  ;;  %vm430_vm5 = vweird.f32 %v403_v6  ;;  %vm492_vm11 = vmor %vm490_vm10, %vm491_vm8  ;;  %895 = vmatpush.msra.mxu0 %v888_v55 }
 0x3bf   :  { %v487_v58 = vsub.f32 1.0, %v486_v56  ;;  %v887_v56 = vld [vmem:[%s1421_s4 + $0x68] sm:$0xff] }
 0x3c0   :  { %v437_v4 = vor.u32 1.1754944e-38, %v436_v61  ;;  %vm435_vm9 = vcmp.eq.f32.partialorder %v434_v63, 8.507059e+37  ;;  %896 = vmatpush.msra.mxu0 %v887_v56  ;;  %v885_v63 = vld [vmem:[%s1421_s4 + $0x58] sm:$0xff] }
 0x3c1   :  { %v488_v7 = vmul.f32 %v1015_v53, %v487_v58 }
 0x3c3   :  { %v489_v5 = vadd.f32 %v1015_v53, %v488_v7 }
 0x3c4   :  { %v1017_v57 = vpop.eup %1016 }
 0x3c5   :  { %v426_v59 = vmul.f32 %v1017_v57, %v403_v6  ;;  %vm431_vm4 = vweird.f32 %v1017_v57  ;;  %v493_v13 = vsel %vm492_vm11, %v1015_v53, %v489_v5  ;;  %v884_v5 = vld [vmem:[%s1421_s4 + $0x50] sm:$0xff] }
 0x3c6   :  { %vm432_vm6 = vmor %vm430_vm5, %vm431_vm4  ;;  %v498_v15 = vsel %vm495_vm12, %v497_v14, %v493_v13 }
 0x3c7   :  { %v427_v60 = vsub.f32 1.0, %v426_v59  ;;  %v499_v16 = vmul.f32 %v1219_v17, %v498_v15  ;;  %v881_v15 = vld [vmem:[%s1421_s4 + $0x38] sm:$0xff] }
 0x3c9   :  { %v428_v62 = vmul.f32 %v1017_v57, %v427_v60  ;;  %v886_v60 = vld [vmem:[%s1421_s4 + $0x60] sm:$0xff] }
 0x3ca   :  { %897 = vmatpush.msra.mxu0 %v886_v60 }
 0x3cb   :  { %v429_v3 = vadd.f32 %v1017_v57, %v428_v62 }
 0x3cc   :  { %898 = vmatpush.msra.mxu0 %v885_v63 }
 0x3cd   :  { %v433_v8 = vsel %vm432_vm6, %v1017_v57, %v429_v3 }
 0x3ce   :  { %v438_v10 = vsel %vm435_vm9, %v437_v4, %v433_v8  ;;  %899 = vmatpush.msra.mxu0 %v884_v5 }
 0x3cf   :  { %v439_v12 = vmul.f32 %v1223_v48, %v438_v10  ;;  %v883_v10 = vld [vmem:[%s1421_s4 + $0x48] sm:$0xff] }
 0x3d0   :  { %900 = vmatpush.msra.mxu0 %v883_v10 }
 0x3d1   :  { %943 = vmatmul.msk.f32.vlgmr.msra.gmra.mxu3 %vm128_vm7, %v439_v12  ;;  %v882_v12 = vld [vmem:[%s1421_s4 + $0x40] sm:$0xff] }
 0x3d2   :  { %861 = vmatpush.msra.mxu3 %v838_v30  ;;  %901 = vmatpush.msra.mxu0 %v882_v12 }
 0x3d4   :  { %902 = vmatpush.msra.mxu0 %v881_v15 }
 0x3d9   :  { %947 = vmatmul.msk.f32.vlgmr.msrb.gmra.mxu3 %vm128_vm7, %v499_v16 }
 0x3fd   :  { %v620_v47 = vpop.f32.mrf.mxu1 }
 0x413   :  { %v594_v50 = vpop.f32.mrf.mxu0 }
 0x414   :  { %754 = vrot.lane.b32.xlu1 %v594_v50, %s1027_s12 }
 0x417   :  { %v724_v46 = vpop.f32.mrf.mxu1 }
 0x418   :  { %775 = vrot.lane.b32.xlu2 %v724_v46, %s1028_s13  ;;  %v879_v46 = vld [vmem:[%s1421_s4 + $0x28] sm:$0xff] }
 0x419   :  { %v646_v44 = vpop.f32.mrf.mxu2 }
 0x41a   :  { %762 = vrot.lane.b32.xlu0 %v646_v44, %s1029_s14 }
 0x41b   :  { %v698_v48 = vpop.f32.mrf.mxu0 }
 0x41c   :  { %758 = vrot.lane.b32.xlu1 %v620_v47, %s1028_s13  ;;  %v880_v47 = vld [vmem:[%s1421_s4 + $0x30] sm:$0xff] }
 0x41d   :  { %903 = vmatpush.msra.mxu0 %v880_v47 }
 0x41f   :  { %904 = vmatpush.msra.mxu0 %v879_v46 }
 0x421   :  { %v750_v49 = vpop.f32.mrf.mxu2 }
 0x424   :  { %771 = vrot.lane.b32.xlu1 %v698_v48, %s1027_s12  ;;  %v878_v48 = vld [vmem:[%s1421_s4 + $0x20] sm:$0xff] }
 0x425   :  { %905 = vmatpush.msra.mxu0 %v878_v48 }
 0x42c   :  { %779 = vrot.lane.b32.xlu1 %v750_v49, %s1029_s14 }
 0x454   :  { %v568_v17 = vpop.f32.mrf.mxu3 }
 0x45c   :  { %v672_v27 = vpop.f32.mrf.mxu3 }
 0x472   :  { %v776_v29 = vpop.permute.xlu2 %775 }
 0x486   :  { %v755_v51 = vpop.permute.xlu1 %754 }
 0x487   :  { %v765_v45 = vsel %vm128_vm7, %v568_v17, %v755_v51  ;;  %v877_v51 = vld [vmem:[%s1421_s4 + $0x18] sm:$0xff] }
 0x488   :  { %906 = vmatpush.msra.mxu0 %v877_v51 }
 0x48c   :  { %v763_v37 = vpop.permute.xlu0 %762 }
 0x48e   :  { %v759_v18 = vpop.permute.xlu1 %758 }
 0x48f   :  { %v767_v20 = vsel %vm766_vm13, %v765_v45, %v759_v18 }
 0x490   :  { %v769_v21 = vsel %vm768_vm14, %v767_v20, %v763_v37 }
 0x491   :  { %v1319_v22 = vadd.f32 %v769_v21, %v1073_v1 }
 0x493   :  { %v787_v23 = vsel %vm25_vm0, %v1319_v22, 0.0  ;;  %v793_v24 = vmul.f32 %v1319_v22, %v1319_v22 }
 0x494   :  { %788 = vadd.xlane.f32.xlu1 %v787_v23  ;;  %v876_v23 = vld [vmem:[%s1421_s4 + $0x10] sm:$0xff] }
 0x495   :  { %v795_v25 = vsel %vm25_vm0, %v793_v24, 0.0  ;;  %907 = vmatpush.msra.mxu0 %v876_v23  ;;  %v875_v24 = vld [vmem:[%s1421_s4 + $0x8] sm:$0xff] }
 0x496   :  { %796 = vadd.xlane.f32.xlu0 %v795_v25  ;;  %v772_v26 = vpop.permute.xlu1 %771  ;;  %v874_v25 = vld [vmem:[%s1421_s4] sm:$0xff] }
 0x497   :  { %v782_v28 = vsel %vm128_vm7, %v672_v27, %v772_v26  ;;  %908 = vmatpush.msra.mxu0 %v875_v24  ;;  %v980_v26 = vld [vmem:[%s1419_s3] ss:$0 sm:$0xff] }
 0x498   :  { %v783_v32 = vsel %vm766_vm13, %v782_v28, %v776_v29 }
 0x499   :  { %909 = vmatpush.msra.mxu0 %v874_v25 }
 0x49e   :  { %v780_v31 = vpop.permute.xlu1 %779 }
 0x49f   :  { %v784_v1 = vsel %vm768_vm14, %v783_v32, %v780_v31 }
 0x4a0   :  { %v1330_v33 = vadd.f32 %v784_v1, %v1068_v0  ;;  %v837_v0 = vld [vmem:[%s1420_s2 + $0x10] sm:$0xff] }
 0x4a1   :  { %862 = vmatpush.msra.mxu3 %v837_v0 }
 0x4a2   :  { %v790_v19 = vsel %vm25_vm0, %v1330_v33, 0.0  ;;  %v794_v34 = vmul.f32 %v1330_v33, %v1330_v33 }
 0x4a3   :  { %791 = vadd.xlane.f32.xlu2 %v790_v19  ;;  %863 = vmatpush.msra.mxu3 %v836_v35  ;;  %v981_v19 = vld [vmem:[%s1422_s5] ss:$0 sm:$0xff] }
 0x4a4   :  { %v798_v2 = vsel %vm25_vm0, %v794_v34, 0.0 }
 0x4a5   :  { %799 = vadd.xlane.f32.xlu1 %v798_v2  ;;  %864 = vmatpush.msra.mxu3 %v835_v36 }
 0x507   :  { %v789_v38 = vpop.xlane.xlu1 %788 }
 0x508   :  { %v801_v39 = vmul.f32 0.03125, %v789_v38 }
 0x509   :  { %v797_v42 = vpop.xlane.xlu0 %796 }
 0x50a   :  { %v803_v40 = vmul.f32 %v801_v39, %v789_v38  ;;  %v809_v13 = vsub.f32 %v1319_v22, %v801_v39 }
 0x50c   :  { %v805_v43 = vsub.f32 %v797_v42, %v803_v40 }
 0x50e   :  { %v807_v52 = vmul.f32 0.032258064, %v805_v43 }
 0x510   :  { %v811_v41 = vadd.f32 1e-05, %v807_v52 }
 0x512   :  { %1018 = vrsqrt.f32 %v811_v41  ;;  %vm819_vm15 = vweird.f32 %v811_v41 }
 0x516   :  { %v792_v6 = vpop.xlane.xlu2 %791 }
 0x517   :  { %v802_v53 = vmul.f32 0.03125, %v792_v6 }
 0x518   :  { %v1019_v57 = vpop.eup %1018  ;;  %v800_v61 = vpop.xlane.xlu1 %799 }
 0x519   :  { %v814_v58 = vmul.f32 %v1019_v57, %v811_v41  ;;  %v804_v59 = vmul.f32 %v802_v53, %v792_v6  ;;  %vm820_vm7 = vweird.f32 %v1019_v57  ;;  %v810_v37 = vsub.f32 %v1330_v33, %v802_v53 }
 0x51a   :  { %vm821_vm1 = vmor %vm819_vm15, %vm820_vm7 }
 0x51b   :  { %v815_v7 = vmul.f32 %v1019_v57, %v814_v58  ;;  %v806_v62 = vsub.f32 %v800_v61, %v804_v59 }
 0x51d   :  { %v816_v3 = vmul.f32 0.5, %v815_v7  ;;  %v808_v4 = vmul.f32 0.032258064, %v806_v62 }
 0x51f   :  { %v817_v8 = vsub.f32 1.5, %v816_v3  ;;  %v812_v9 = vadd.f32 1e-05, %v808_v4 }
 0x521   :  { %v818_v11 = vmul.f32 %v1019_v57, %v817_v8  ;;  %1020 = vrsqrt.f32 %v812_v9  ;;  %vm829_vm3 = vweird.f32 %v812_v9 }
 0x523   :  { %v822_v14 = vsel %vm821_vm1, %v1019_v57, %v818_v11 }
 0x524   :  { %v833_v16 = vmul.f32 %v822_v14, %v809_v13 }
 0x526   :  { %951 = vmatmul.msk.f32.vlgmr.msra.gmra.mxu3 %vm25_vm0, %v833_v16 }
 0x527   :  { %v1021_v50 = vpop.eup %1020 }
 0x528   :  { %v824_v44 = vmul.f32 %v1021_v50, %v812_v9  ;;  %vm830_vm2 = vweird.f32 %v1021_v50 }
 0x529   :  { %vm831_vm4 = vmor %vm829_vm3, %vm830_vm2 }
 0x52a   :  { %v825_v49 = vmul.f32 %v1021_v50, %v824_v44 }
 0x52c   :  { %v826_v17 = vmul.f32 0.5, %v825_v49 }
 0x52e   :  { %v827_v45 = vsub.f32 1.5, %v826_v17 }
 0x530   :  { %v828_v18 = vmul.f32 %v1021_v50, %v827_v45 }
 0x532   :  { %v832_v20 = vsel %vm831_vm4, %v1021_v50, %v828_v18 }
 0x533   :  { %v834_v21 = vmul.f32 %v832_v20, %v810_v37 }
 0x535   :  { %952 = vmatmul.msk.f32.gmra.mxu3 %vm25_vm0, %v834_v21 }
 0x5a9   :  { %v866_v27 = vpop.f32.mrf.mxu3 }
 0x5aa   :  { %v867_v28 = vadd.f32 %v980_v26, %v866_v27 }
 0x5ac   :  { %v872_v29 = vmax.f32 %v867_v28, 0.0 }
 0x5ae   :  { %910 = vmatmul.f32.vlgmr.msra.gmra.mxu0 %v872_v29 }
 0x5b8   :  { %v869_v31 = vpop.f32.mrf.mxu3 }
 0x5b9   :  { %v870_v32 = vadd.f32 %v980_v26, %v869_v31 }
 0x5bb   :  { %v873_v1 = vmax.f32 %v870_v32, 0.0 }
 0x5bd   :  { %913 = vmatmul.f32.gmra.mxu0 %v873_v1 }
 0x62b   :  { %v911_v34 = vpop.f32.mrf.mxu0 }
 0x62c   :  { %v912_v2 = vadd.f32 %v981_v19, %v911_v34 }
 0x62e   :  { %v917_v30 = vadd.f32 %v912_v2, %v1319_v22 }
 0x630   :  { %919 = vst.msk [vmem:[%s1423_s6] sm:$0xff] %vm25_vm0, %v917_v30 }
 0x63a   :  { %v914_v0 = vpop.f32.mrf.mxu0 }
 0x63b   :  { %v915_v35 = vadd.f32 %v981_v19, %v914_v0 }
 0x63d   :  { %v918_v36 = vadd.f32 %v915_v35, %v1330_v33 }
 0x63f   :  { %920 = vst.msk [vmem:[%s1423_s6 + $0x8] sm:$0xff] %vm25_vm0, %v918_v36 }

</bundles_post_ra>
